<compile_context>
chip_gen: v7x
topology: tpu7x:2x2x1
jax: 0.10.0
libtpu: 0.0.40
codegen_flags: <defaults>
</compile_context>

<pallas_src>
import functools

import jax
import jax.numpy as jnp
from jax.experimental import pallas as pl
from jax.experimental.pallas import tpu as pltpu


_NEG_LARGE = -1e30  # acts as -inf for padded vocab columns (avoids inf-inf NaNs)


def _round_up(x, m):
    return ((x + m - 1) // m) * m


def _ceil_div(a, b):
    return -(-a // b)


# --------------------------------------------------------------------------
# Kernel
# --------------------------------------------------------------------------
def decoder_kernel(x_ref, wt_ref, shift_ref, o_ref):
    """One batch tile: bf16 matmul (f32 accum) + folded affine + log_softmax."""
    z = jnp.dot(x_ref[...], wt_ref[...], preferred_element_type=jnp.float32)
    z = z + shift_ref[...]                           # folded bias/BN, (1, Vp) f32
    # Numerically stable log_softmax over the (padded) vocab axis, all in f32.
    m = jnp.max(z, axis=-1, keepdims=True)
    lse = jnp.log(jnp.sum(jnp.exp(z - m), axis=-1, keepdims=True)) + m
    o_ref[...] = (z - lse).astype(o_ref.dtype)       # only the store is low-precision


# --------------------------------------------------------------------------
# One-time parameter folding
# --------------------------------------------------------------------------
def fold_decoder_params(w, bias, gamma, beta, running_mean, running_var,
                        eps=1e-5, *, compute_dtype=jnp.bfloat16):
    """Fold eval-BN + bias into (Wt', shift'), pad V to a multiple of 128."""
    vocab_size, _ = w.shape
    scale = gamma / jnp.sqrt(running_var + eps)                 # (V,)
    shift = bias * scale + beta - running_mean * scale          # (V,)
    wt = (w * scale[:, None]).T                                 # (T, V), f32
    v_pad = _round_up(vocab_size, 128)
    if v_pad != vocab_size:
        wt = jnp.pad(wt, ((0, 0), (0, v_pad - vocab_size)))
        shift = jnp.pad(shift, (0, v_pad - vocab_size),
                        constant_values=_NEG_LARGE)
    return wt.astype(compute_dtype), shift.reshape(1, v_pad).astype(jnp.float32)


# --------------------------------------------------------------------------
# VMEM planning / tile selection (host-side, static)
# --------------------------------------------------------------------------
def _vmem_plan():
    """Generation-aware (tile budget, vmem_limit) derived from physical VMEM."""
    try:
        cap = int(pltpu.get_tpu_info().vmem_capacity_bytes)
    except Exception:
        cap = 128 << 20
    if cap <= 64 << 20:                  # v7x-class: 64 MiB per TensorCore
        return 40 << 20, 48 << 20
    return 80 << 20, 96 << 20            # v5e / v6e: 128 MiB physical


def _pick_batch_tile(B, T, Vp, out_bytes, wt_buf_bytes, budget_bytes,
                     prefer_grid_multiple=2):
    """Padding-aware batch-tile selection.

    Chooses tb = round_up(ceil(B / n_tiles), 8) for the smallest n_tiles whose
    per-step VMEM footprint fits, preferring a grid-step count that is a
    multiple of `prefer_grid_multiple` so v7x's 2 TensorCores get balanced
    work (harmless on single-TC v5e/v6e).
    """
    def footprint(tb):
        return (tb * Vp * (3 * 4 + 2 * out_bytes)  # f32 temporaries + 2x out block
                + 2 * tb * T * 2                   # double-buffered bf16 x tile
                + wt_buf_bytes                     # folded Wt (worst-case 2 buffers)
                + 2 * Vp * 4)                      # shift

    candidates = []
    seen = set()
    for n_tiles in range(1, max(1, _ceil_div(B, 8)) + 1):
        tb = _round_up(_ceil_div(B, n_tiles), 8)
        if tb in seen:
            continue
        seen.add(tb)
        if footprint(tb) <= budget_bytes:
            candidates.append((_ceil_div(B, tb), tb))   # (grid steps, tile)
    if not candidates:
        return 8  # minimum legal tile; rely on vmem_limit headroom
    if prefer_grid_multiple > 1 and B > 8:
        for steps, tb in candidates:
            if steps % prefer_grid_multiple == 0:
                return tb
    return candidates[0][1]


# --------------------------------------------------------------------------
# pallas_call wrapper
# --------------------------------------------------------------------------
@functools.partial(
    jax.jit,
    static_argnames=("tb", "vocab_size", "out_dtype", "vmem_limit_bytes",
                     "single_buffer_consts"))
def _decoder_impl(x, wt, shift, *, tb, vocab_size, out_dtype,
                  vmem_limit_bytes, single_buffer_consts):
    B, T = x.shape
    Tw, Vp = wt.shape
    Bp = _round_up(B, tb)

    # Cast to the MXU-native dtype once here (not per tile inside the kernel).
    x = x.astype(jnp.bfloat16)
    if Bp != B:
        x = jnp.pad(x, ((0, Bp - B), (0, 0)))

    # Constant-index operands never change across the grid; single-buffer them
    # to reclaim VMEM (their constant index_map already prevents re-DMA).
    const_kw = {"pipeline_mode": pl.Buffered(1)} if single_buffer_consts else {}

    out = pl.pallas_call(
        decoder_kernel,
        out_shape=jax.ShapeDtypeStruct((Bp, Vp), out_dtype),
        grid_spec=pltpu.PrefetchScalarGridSpec(
            num_scalar_prefetch=0,
            grid=(Bp // tb,),
            in_specs=[
                pl.BlockSpec((tb, T), lambda i: (i, 0)),              # x tile (bf16)
                pl.BlockSpec((T, Vp), lambda i: (0, 0), **const_kw),  # folded Wt
                pl.BlockSpec((1, Vp), lambda i: (0, 0), **const_kw),  # folded shift
            ],
            out_specs=pl.BlockSpec((tb, Vp), lambda i: (i, 0)),
        ),
        compiler_params=pltpu.CompilerParams(
            dimension_semantics=("parallel",),   # batch tiles shard across TCs
            vmem_limit_bytes=vmem_limit_bytes,
        ),
    )(x, wt, shift)
    return out[:B, :vocab_size]


def decoder_forward(x, wt, shift, *, vocab_size, out_dtype=jnp.bfloat16,
                    batch_tile=None):
    """x: (B, T) f32; wt: (T, Vp) bf16; shift: (1, Vp) f32 -> (B, V) log-probs."""
    B, T = x.shape
    Tw, Vp = wt.shape
    assert T == Tw and Vp % 128 == 0 and shift.shape == (1, Vp)
    assert vocab_size <= Vp

    budget_bytes, vmem_limit = _vmem_plan()
    out_bytes = jnp.dtype(out_dtype).itemsize
    # Count Wt' twice in case the single-buffer fallback path double-buffers it.
    wt_buf_bytes = 2 * T * Vp * jnp.dtype(wt.dtype).itemsize
    tb = batch_tile or _pick_batch_tile(B, T, Vp, out_bytes, wt_buf_bytes,
                                        budget_bytes)

    kwargs = dict(tb=tb, vocab_size=vocab_size, out_dtype=out_dtype,
                  vmem_limit_bytes=vmem_limit)
    try:
        return _decoder_impl(x, wt, shift, single_buffer_consts=True, **kwargs)
    except Exception:
        # Fallback for JAX versions whose TPU lowering rejects pl.Buffered(1)
        # on constant operands.
        return _decoder_impl(x, wt, shift, single_buffer_consts=False, **kwargs)


# --------------------------------------------------------------------------
# Pure-JAX reference (eval-mode Decoder.forward)
# --------------------------------------------------------------------------
def reference_forward(x, w, bias, gamma, beta, mean, var, eps):
    y = x @ w.T + bias
    z = (y - mean) / jnp.sqrt(var + eps) * gamma + beta
    return jax.nn.log_softmax(z, axis=1)


if __name__ == "__main__":
    # Shapes consistent with Decoder(vocab_size, num_topics, dropout);
    # batch=200 / vocab=500 exercise both padding paths and a multi-step grid.
    batch, num_topics, vocab_size = 200, 32, 500
    eps = 1e-5

    key = jax.random.PRNGKey(0)
    k_x, k_w, k_b, k_g, k_be, k_rm, k_rv = jax.random.split(key, 7)

    x = jax.random.normal(k_x, (batch, num_topics), dtype=jnp.float32)
    # nn.Linear(num_topics, vocab_size): weight (V, T), bias (V,)
    w = jax.random.normal(k_w, (vocab_size, num_topics), dtype=jnp.float32) * 0.1
    bias = jax.random.normal(k_b, (vocab_size,), dtype=jnp.float32) * 0.05
    # nn.BatchNorm1d(vocab_size) affine params + running stats (eval mode).
    gamma = 1.0 + 0.1 * jax.random.normal(k_g, (vocab_size,), dtype=jnp.float32)
    beta = 0.05 * jax.random.normal(k_be, (vocab_size,), dtype=jnp.float32)
    running_mean = 0.1 * jax.random.normal(k_rm, (vocab_size,), dtype=jnp.float32)
    running_var = jnp.abs(
        1.0 + 0.1 * jax.random.normal(k_rv, (vocab_size,), dtype=jnp.float32))

    # One-time prep: fold bias + eval-BN into (Wt', shift'), pad V to 128.
    wt, shift = fold_decoder_params(w, bias, gamma, beta, running_mean,
                                    running_var, eps)

    ref = reference_forward(x, w, bias, gamma, beta, running_mean,
                            running_var, eps)

    # Default (performance) path: bf16 output.
    out_bf16 = jax.block_until_ready(
        decoder_forward(x, wt, shift, vocab_size=vocab_size))
    assert out_bf16.shape == (batch, vocab_size)
    assert out_bf16.dtype == jnp.bfloat16
    out_b = out_bf16.astype(jnp.float32)
    assert bool(jnp.all(jnp.isfinite(out_b)))
    # bf16 store of log-probs: allow bf16-ulp-level noise on top of bf16 matmul.
    assert jnp.allclose(out_b, ref, atol=1e-1, rtol=2e-2), (
        float(jnp.max(jnp.abs(out_b - ref))))
    assert jnp.allclose(jnp.sum(jnp.exp(out_b), axis=1), 1.0, atol=5e-2)

    # Full-precision output path: tighter checks.
    out_f32 = jax.block_until_ready(
        decoder_forward(x, wt, shift, vocab_size=vocab_size,
                        out_dtype=jnp.float32))
    assert out_f32.shape == (batch, vocab_size)
    assert bool(jnp.all(jnp.isfinite(out_f32)))
    # bf16 matmul inputs with f32 accumulation: allow a few e-3 of noise.
    assert jnp.allclose(out_f32, ref, atol=3e-2, rtol=3e-3), (
        float(jnp.max(jnp.abs(out_f32 - ref))))
    # Rows must be valid log-probabilities.
    assert jnp.allclose(jnp.sum(jnp.exp(out_f32), axis=1), 1.0, atol=1e-3)

    print("KERNEL_OK")
</pallas_src>

<mosaic_0001>
module attributes {stable_mosaic.version = 11 : i64} {
  func.func @decoder_kernel(%arg0: i32, %arg1: memref<104x32xbf16, #tpu.memory_space<vmem>>, %arg2: memref<32x512xbf16, #tpu.memory_space<vmem>>, %arg3: memref<1x512xf32, #tpu.memory_space<vmem>>, %arg4: memref<104x512xbf16, #tpu.memory_space<vmem>>) attributes {dimension_semantics = [#tpu.dimension_semantics<parallel>], iteration_bounds = array<i64: 2>, scalar_prefetch = 0 : i64, scratch_operands = 0 : i64, tpu.core_type = #tpu.core_type<tc>, window_params = [{transform_indices = @transform_0, window_bounds = array<i64: 104, 32>}, {pipeline_mode = #tpu.pipeline_mode<synchronous>, transform_indices = @transform_1, window_bounds = array<i64: 32, 512>}, {pipeline_mode = #tpu.pipeline_mode<synchronous>, transform_indices = @transform_2, window_bounds = array<i64: 1, 512>}, {transform_indices = @transform_3, window_bounds = array<i64: 104, 512>}]} {
    %c0 = arith.constant 0 : index
    %c0_0 = arith.constant 0 : index
    %0 = vector.load %arg1[%c0, %c0_0] : memref<104x32xbf16, #tpu.memory_space<vmem>>, vector<104x32xbf16>
    %c0_1 = arith.constant 0 : index
    %c0_2 = arith.constant 0 : index
    %1 = vector.load %arg2[%c0_1, %c0_2] : memref<32x512xbf16, #tpu.memory_space<vmem>>, vector<32x512xbf16>
    %cst = arith.constant dense<0.000000e+00> : vector<104x512xf32>
    %2 = tpu.matmul %0, %1, %cst {dimension_numbers = #tpu.dot_dimension_numbers<[1], [0], [0], [1], [0, 0, 1, 1], [], []>} : vector<104x32xbf16>, vector<32x512xbf16>, vector<104x512xf32> -> vector<104x512xf32>
    %c0_3 = arith.constant 0 : index
    %c0_4 = arith.constant 0 : index
    %3 = vector.load %arg3[%c0_3, %c0_4] : memref<1x512xf32, #tpu.memory_space<vmem>>, vector<1x512xf32>
    %4 = vector.broadcast %3 : vector<1x512xf32> to vector<104x512xf32>
    %5 = arith.addf %2, %4 : vector<104x512xf32>
    %cst_5 = arith.constant dense<0xFF800000> : vector<104xf32>
    %6 = vector.multi_reduction <maximumf>, %5, %cst_5 [1] : vector<104x512xf32> to vector<104xf32>
    %7 = vector.shape_cast %6 : vector<104xf32> to vector<104x1xf32>
    %8 = vector.broadcast %7 : vector<104x1xf32> to vector<104x512xf32>
    %9 = arith.subf %5, %8 : vector<104x512xf32>
    %10 = math.exp %9 : vector<104x512xf32>
    %cst_6 = arith.constant dense<0.000000e+00> : vector<104xf32>
    %11 = vector.multi_reduction <add>, %10, %cst_6 [1] : vector<104x512xf32> to vector<104xf32>
    %12 = vector.shape_cast %11 : vector<104xf32> to vector<104x1xf32>
    %13 = math.log %12 : vector<104x1xf32>
    %14 = arith.addf %13, %7 : vector<104x1xf32>
    %15 = vector.broadcast %14 : vector<104x1xf32> to vector<104x512xf32>
    %16 = arith.subf %5, %15 : vector<104x512xf32>
    %17 = arith.truncf %16 : vector<104x512xf32> to vector<104x512xbf16>
    %c0_7 = arith.constant 0 : index
    %c0_8 = arith.constant 0 : index
    %18 = vector.load %arg4[%c0_7, %c0_8] : memref<104x512xbf16, #tpu.memory_space<vmem>>, vector<104x512xbf16>
    tpu.vector_store %arg4[%c0_7, %c0_8], %17 {strides = array<i32>} : memref<104x512xbf16, #tpu.memory_space<vmem>>, vector<104x512xbf16>,
    return
  }
  func.func @transform_0(%arg0: i32) -> (i32, i32) {
    %c0_i32 = arith.constant 0 : i32
    %c0_i32_0 = arith.constant 0 : i32
    return %arg0, %c0_i32 : i32, i32
  }
  func.func @transform_1(%arg0: i32) -> (i32, i32) {
    %c0_i32 = arith.constant 0 : i32
    %c0_i32_0 = arith.constant 0 : i32
    %c0_i32_1 = arith.constant 0 : i32
    return %c0_i32, %c0_i32_0 : i32, i32
  }
  func.func @transform_2(%arg0: i32) -> (i32, i32) {
    %c0_i32 = arith.constant 0 : i32
    %c0_i32_0 = arith.constant 0 : i32
    %c0_i32_1 = arith.constant 0 : i32
    return %c0_i32, %c0_i32_0 : i32, i32
  }
  func.func @transform_3(%arg0: i32) -> (i32, i32) {
    %c0_i32 = arith.constant 0 : i32
    %c0_i32_0 = arith.constant 0 : i32
    return %arg0, %c0_i32 : i32, i32
  }
}

module attributes {stable_mosaic.version = 11 : i64} {
  func.func @decoder_kernel(%arg0: i32, %arg1: memref<104x32xbf16, #tpu.memory_space<vmem>>, %arg2: memref<32x512xbf16, #tpu.memory_space<vmem>>, %arg3: memref<1x512xf32, #tpu.memory_space<vmem>>, %arg4: memref<104x512xbf16, #tpu.memory_space<vmem>>) attributes {dimension_semantics = [#tpu.dimension_semantics<parallel>], iteration_bounds = array<i64: 2>, scalar_prefetch = 0 : i64, scratch_operands = 0 : i64, tpu.core_type = #tpu.core_type<tc>, window_params = [{transform_indices = @transform_0, window_bounds = array<i64: 104, 32>}, {pipeline_mode = #tpu.pipeline_mode<synchronous>, transform_indices = @transform_1, window_bounds = array<i64: 32, 512>}, {pipeline_mode = #tpu.pipeline_mode<synchronous>, transform_indices = @transform_2, window_bounds = array<i64: 1, 512>}, {transform_indices = @transform_3, window_bounds = array<i64: 104, 512>}]} {
    %c0 = arith.constant 0 : index
    %c0_0 = arith.constant 0 : index
    %0 = vector.load %arg1[%c0, %c0_0] : memref<104x32xbf16, #tpu.memory_space<vmem>>, vector<104x32xbf16>
    %c0_1 = arith.constant 0 : index
    %c0_2 = arith.constant 0 : index
    %1 = vector.load %arg2[%c0_1, %c0_2] : memref<32x512xbf16, #tpu.memory_space<vmem>>, vector<32x512xbf16>
    %cst = arith.constant dense<0.000000e+00> : vector<104x512xf32>
    %2 = tpu.matmul %0, %1, %cst {dimension_numbers = #tpu.dot_dimension_numbers<[1], [0], [0], [1], [0, 0, 1, 1], [], []>} : vector<104x32xbf16>, vector<32x512xbf16>, vector<104x512xf32> -> vector<104x512xf32>
    %c0_3 = arith.constant 0 : index
    %c0_4 = arith.constant 0 : index
    %3 = vector.load %arg3[%c0_3, %c0_4] : memref<1x512xf32, #tpu.memory_space<vmem>>, vector<1x512xf32>
    %4 = vector.broadcast %3 : vector<1x512xf32> to vector<104x512xf32>
    %5 = arith.addf %2, %4 : vector<104x512xf32>
    %cst_5 = arith.constant dense<0xFF800000> : vector<104xf32>
    %6 = vector.multi_reduction <maximumf>, %5, %cst_5 [1] : vector<104x512xf32> to vector<104xf32>
    %7 = vector.shape_cast %6 : vector<104xf32> to vector<104x1xf32>
    %8 = vector.broadcast %7 : vector<104x1xf32> to vector<104x512xf32>
    %9 = arith.subf %5, %8 : vector<104x512xf32>
    %10 = math.exp %9 : vector<104x512xf32>
    %cst_6 = arith.constant dense<0.000000e+00> : vector<104xf32>
    %11 = vector.multi_reduction <add>, %10, %cst_6 [1] : vector<104x512xf32> to vector<104xf32>
    %12 = vector.shape_cast %11 : vector<104xf32> to vector<104x1xf32>
    %13 = math.log %12 : vector<104x1xf32>
    %14 = arith.addf %13, %7 : vector<104x1xf32>
    %15 = vector.broadcast %14 : vector<104x1xf32> to vector<104x512xf32>
    %16 = arith.subf %5, %15 : vector<104x512xf32>
    %17 = arith.truncf %16 : vector<104x512xf32> to vector<104x512xbf16>
    %c0_7 = arith.constant 0 : index
    %c0_8 = arith.constant 0 : index
    %18 = vector.load %arg4[%c0_7, %c0_8] : memref<104x512xbf16, #tpu.memory_space<vmem>>, vector<104x512xbf16>
    tpu.vector_store %arg4[%c0_7, %c0_8], %17 {strides = array<i32>} : memref<104x512xbf16, #tpu.memory_space<vmem>>, vector<104x512xbf16>,
    return
  }
  func.func @transform_0(%arg0: i32) -> (i32, i32) {
    %c0_i32 = arith.constant 0 : i32
    %c0_i32_0 = arith.constant 0 : i32
    return %arg0, %c0_i32 : i32, i32
  }
  func.func @transform_1(%arg0: i32) -> (i32, i32) {
    %c0_i32 = arith.constant 0 : i32
    %c0_i32_0 = arith.constant 0 : i32
    %c0_i32_1 = arith.constant 0 : i32
    return %c0_i32, %c0_i32_0 : i32, i32
  }
  func.func @transform_2(%arg0: i32) -> (i32, i32) {
    %c0_i32 = arith.constant 0 : i32
    %c0_i32_0 = arith.constant 0 : i32
    %c0_i32_1 = arith.constant 0 : i32
    return %c0_i32, %c0_i32_0 : i32, i32
  }
  func.func @transform_3(%arg0: i32) -> (i32, i32) {
    %c0_i32 = arith.constant 0 : i32
    %c0_i32_0 = arith.constant 0 : i32
    return %arg0, %c0_i32 : i32, i32
  }
}

</mosaic_0001>

<bundles_post_ra>
// kernel: _decoder_impl.1
= control target key start
LH: loop header
LB: loop body
LE: loop exit
PB: predicated region body
PF: predicated region fallthrough
CT: control target
= control target key end

     0   :  { %8 = vsyncpa [#allocation3], 0  ;;  %s2440_s0 = inlined_call_operand.hbm [shape: bf16[208,32], index: 0, kind: input, shape index: {}]   ;;  %s2441_s1 = inlined_call_operand.hbm [shape: bf16[32,512], index: 1, kind: input, shape index: {}]   ;;  %s2442_s2 = inlined_call_operand.hbm [shape: f32[1,512], index: 2, kind: input, shape index: {}]   ;;  %s2443_s3 = inlined_call_operand.hbm [shape: bf16[208,512], index: 3, kind: output, shape index: {}]  }
   0x1   :  { %10 = vsyncpa [#allocation3 + $0x1], 0 }
   0x2   :  { %11 = vsyncpa [#allocation6], 0 }
   0x3   :  { %12 = vsyncpa [#allocation4], 0 }
   0x4   :  { %14 = vsyncpa [#allocation4 + $0x1], 0  ;;  %s1742_s12 = smov 0   ;;  %s1744_s13 = smov 0  }
   0x5   :  { %s1746_s14 = smov 0   ;;  %s1748_s15 = smov 0  }
   0x6 LB: > { %s1763_s16 = sadd.s32 4294967295, %s1709_s15   ;;  %s1229_s17 = sadd.s32 4294967294, %s1709_s15   ;;  %s1709_s15 = sphi %s1748_s15, %s2550_s15   ;;  %s1705_s14 = sphi %s1746_s14, %s2549_s14   ;;  %s1701_s13 = sphi %s1744_s13, %s2548_s13   ;;  %s1697_s12 = sphi %s1742_s12, %s2547_s12  }
   0x7   : > { %p40_p0 = scmp.ne.s32.totalorder %s1701_s13, %s1697_s12  ;;  %p2444_p1 = scmp.eq.s32.totalorder %s1763_s16, 0 }
   0x8   : > { %p112_p3 = scmp.eq.s32.totalorder %s1229_s17, 1  ;;  %p1230_p5 = scmp.ge.s32.totalorder %s1709_s15, 1 }
   0x9   : > { %p1772_p4 = por %p2444_p1, %p40_p0  ;;  %p119_p7 = scmp.lt.s32.totalorder %s1709_s15, 3 }
   0xa   : > { %p1777_p6 = por %p112_p3, %p40_p0  ;;  %s1711_s21 = smov [#allocation5]  }
   0xb   : > { %s2477_s18 = scalar_select %p1772_p4, 1, 0 }
   0xc   : > { %s2478_s19 = scalar_select %p1777_p6, 1, 0 }
   0xd   : > { %p1782_p8 = pnand %p1230_p5, %p119_p7  ;;  %s131_s22 = sshll.u32 %s1711_s21, 4  ;;  %s1786_s22 = int_to_ptr.vmem [resolvable:$true] %s131_s22 }
   0xe   : > { %s1712_s24 = smov [#allocation7]   ;;  %s1553_s28 = scalar_lea.hbm %s2441_s1, 1024 }
   0xf   : > { %p1342_p9 = pneg %p1782_p8  ;;  %s145_s25 = sshll.u32 %s1712_s24, 4  ;;  %s1797_s25 = int_to_ptr.vmem [resolvable:$true] %s145_s25 }
  0x10   : > { %p1554_p12 = scmp.ne.s32.totalorder %s2441_s1, %s1553_s28  ;;  %p1560_p5 = scmp.lt.u32.totalorder %s1553_s28, %s2441_s1 }
  0x11   : > { %p1793_p11 = pnand %p1342_p9, %p2444_p1 }
  0x13   : > { %p1555_p13 = pneg %p1793_p11 }
  0x15   : > { %p1556_p0 = pnand %p1555_p13, %p1554_p12 }
  0x17   : > { %p1557_p3 = pneg %p1556_p0 }
  0x19   : > { %p1562_p7 = pnand %p1560_p5, %p1557_p3 }
  0x1b   : > { %1565 = shalt.err (!%p1562_p7)
}
  0x1c   : > { %s1566_s6 = scalar_lea.vmem %s1786_s22, 1024  ;;  %p1574_p2 = scmp.lt.s32.totalorder %s1786_s22, %s1786_s22 }
  0x1d   : > { %p1567_p9 = scmp.ne.s32.totalorder %s1786_s22, %s1566_s6  ;;  %p1575_p12 = scmp.lt.s32.totalorder %s1566_s6, %s1566_s6 }
  0x1f   : > { %p1569_p10 = pnand %p1567_p9, %p1555_p13  ;;  %p1576_p0 = por %p1575_p12, %p1574_p2 }
  0x21   : > { %p1570_p1 = pneg %p1569_p10 }
  0x23   : > { %p1577_p6 = pnand %p1576_p0, %p1570_p1 }
  0x25   : > { %1580 = shalt.err (!%p1577_p6)
}
  0x26   : > { %s1713_s7 = smov 256   ;;  %s1714_s8 = smov 16  }
  0x27   : > { %1345 = dma.hbm_to_vmem [thread:$0]  (!%p1793_p11), %s2441_s1, 1024, %s1786_s22, [#allocation6], %s1713_s7, %s1713_s7, %s1714_s8  }
  0x28   : > { %s1581_s21 = scalar_lea.hbm %s2442_s2, 64 }
  0x29   : > { %p1582_p2 = scmp.ne.s32.totalorder %s2442_s2, %s1581_s21  ;;  %p1588_p10 = scmp.lt.u32.totalorder %s1581_s21, %s2442_s2 }
  0x2b   : > { %p1584_p1 = pnand %p1582_p2, %p1555_p13 }
  0x2d   : > { %p1585_p6 = pneg %p1584_p1 }
  0x2f   : > { %p1590_p3 = pnand %p1588_p10, %p1585_p6 }
  0x31   : > { %1593 = shalt.err (!%p1590_p3)
}
  0x32   : > { %s1594_s22 = scalar_lea.vmem %s1797_s25, 64  ;;  %p1602_p12 = scmp.lt.s32.totalorder %s1797_s25, %s1797_s25 }
  0x33   : > { %p1595_p5 = scmp.ne.s32.totalorder %s1797_s25, %s1594_s22  ;;  %p1603_p0 = scmp.lt.s32.totalorder %s1594_s22, %s1594_s22 }
  0x35   : > { %p1597_p7 = pnand %p1595_p5, %p1555_p13  ;;  %p1604_p2 = por %p1603_p0, %p1602_p12 }
  0x37   : > { %p1598_p9 = pneg %p1597_p7 }
  0x39   : > { %p1605_p1 = pnand %p1604_p2, %p1598_p9 }
  0x3b   : > { %1608 = shalt.err (!%p1605_p1)
}
  0x3c   : > { %1348 = dma.hbm_to_vmem [thread:$0]  (!%p1793_p11), %s2442_s2, 64, %s1797_s25, [#allocation6]  }
  0x3d   : > { %s1852_s4 = sadd.s32 1, %s1709_s15   ;;  %s27_s23 = sadd.s32 1, %s1705_s14 }
  0x3e   : > { %s24_s5 = ssub.s32 %s1709_s15, %s1852_s4  ;;  %p34_p13 = scmp.ne.s32.totalorder %s1705_s14, %s1701_s13 }
  0x3f   : > { %p25_p6 = scmp.eq.s32.totalorder %s24_s5, 0  ;;  %p35_p10 = scmp.eq.s32.totalorder %s1709_s15, 0 }
  0x40   : > { %p2481_p3 = scmp.eq.s32.totalorder %s1763_s16, 1  ;;  %p1359_p7 = scmp.lt.s32.totalorder %s1709_s15, 2 }
  0x41   : > { %s1868_s7 = scalar_select %p25_p6, %s1705_s14, %s27_s23  }
  0x42   : > { %p1862_p5 = por %p2481_p3, %p34_p13  ;;  %p36_p9 = por %p35_p10, %p34_p13 }
  0x43   : > { %s156_s8 = sand.u32 1, %s1705_s14   ;;  %s1297_s25 = smul.u32 832, %s1709_s15 }
  0x44   : > { %s2482_s6 = scalar_select %p1862_p5, 1, 0 }
  0x45   : > { %s1327_s9 = smul.u32 52, %s156_s8  ;;  %p1872_p11 = pnand %p1359_p7, %p36_p9 }
  0x46   : > { %s1879_s21 = scalar_lea.hbm %s2440_s0, %s1297_s25  ;;  %s1883_s27 = scalar_lea.sflag [#allocation3], %s156_s8 }
  0x47   : > { %s160_s24 = scalar_lea.vmem [#allocation2], %s1327_s9  ;;  %s1609_s28 = scalar_lea.hbm %s1879_s21, 832 }
  0x48   : > { %s167_s26 = sshll.u32 %s160_s24, 4  ;;  %p1610_p12 = scmp.ne.s32.totalorder %s1879_s21, %s1609_s28  ;;  %s1881_s26 = int_to_ptr.vmem [resolvable:$true] %s167_s26 }
  0x49   : > { %p1611_p0 = pneg %p1872_p11  ;;  %s1614_s30 = scalar_lea.hbm %s2440_s0, 1664 }
  0x4a   : > { %p1615_p13 = scmp.lt.u32.totalorder %s1879_s21, %s2440_s0  ;;  %p1616_p6 = scmp.lt.u32.totalorder %s1614_s30, %s1609_s28 }
  0x4b   : > { %p1612_p2 = pnand %p1611_p0, %p1610_p12  ;;  %p1618_p3 = scmp.lt.u32.totalorder %s1609_s28, %s1879_s21 }
  0x4c   : > { %p1617_p10 = por %p1616_p6, %p1615_p13 }
  0x4d   : > { %p1613_p1 = pneg %p1612_p2 }
  0x4e   : > { %p1619_p7 = por %p1618_p3, %p1617_p10 }
  0x50   : > { %p1620_p9 = pnand %p1619_p7, %p1613_p1 }
  0x52   : > { %1623 = shalt.err (!%p1620_p9)
}
  0x53   : > { %s1624_s8 = scalar_lea.vmem %s1881_s26, 832  ;;  %s1715_s9 = smov [#allocation2]  }
  0x54   : > { %p1625_p12 = scmp.ne.s32.totalorder %s1881_s26, %s1624_s8  ;;  %s1629_s25 = sshll.u32 %s1715_s9, 4  ;;  %s1630_s25 = int_to_ptr.vmem [resolvable:$false] %s1629_s25 }
  0x55   : > { %s1631_s11 = scalar_lea.vmem %s1630_s25, 1664  ;;  %p1632_p4 = scmp.lt.s32.totalorder %s1881_s26, %s1630_s25 }
  0x56   : > { %p1627_p2 = pnand %p1625_p12, %p1611_p0  ;;  %p1633_p13 = scmp.lt.s32.totalorder %s1631_s11, %s1624_s8 }
  0x58   : > { %p1628_p5 = pneg %p1627_p2  ;;  %p1634_p6 = por %p1633_p13, %p1632_p4 }
  0x5a   : > { %p1635_p10 = pnand %p1634_p6, %p1628_p5 }
  0x5c   : > { %1638 = shalt.err (!%p1635_p10)
}
  0x5d   : > { %s1716_s17 = smov 64   ;;  %s1717_s24 = smov 4  }
  0x5e   : > { %1352 = dma.hbm_to_vmem [thread:$0]  (!%p1872_p11), %s1879_s21, 832, %s1881_s26, %s1883_s27, %s1716_s17, %s1716_s17, %s1717_s24  }
  0x5f   : > { %179 = sbr.rel (%p1782_p8) target bundleno = 729 (0x2d9), region = 32 }
  0x66   : > { %s1914_s28 = sand.u32 1, %s1701_s13   ;;  %p2484_p4 = scmp.ne.s32.totalorder %s2477_s18, 0 }
  0x67   : > { %s1328_s22 = smul.u32 52, %s1914_s28  ;;  %s182_s29 = scalar_lea.sflag [#allocation3], %s1914_s28 }
  0x69   : > { %s1918_s30 = scalar_lea.vmem [#allocation2], %s1328_s22 }
  0x6a   : > { %1684 = dma.done.wait (%p2484_p4), %s182_s29, 832  }
  0x6b   : > { %1686 = vsyncadd (%p2484_p4), %s182_s29, 4294966464  ;;  %p2485_p5 = scmp.eq.s32.totalorder %s1763_s16, 0 }
  0x6d   : > { %1688 = dma.done.wait (%p2485_p5), [#allocation6], 1088   ;;  %p2486_p8 = pmov %p2485_p5 }
  0x6e   : > { %v1718_v0 = vmov 0   ;;  %v1404_v1 = vld [vmem:[#allocation5 + $0x4] ss:$16 sps:$4 sm:$0xff]   ;;  %v1406_v2 = vld [vmem:[#allocation5 + $0xc] ss:$16 sps:$4 sm:$0xff]   ;;  %vm335_vm0 = vcmask 261120   ;;  %v242_v16 = vlaneseq }
  0x6f   : > { %1690 = vsyncadd (%p2486_p8), [#allocation6], 4294966208  ;;  %389 = vmatprep.mubr.bf16.mxu0 %v1718_v0  ;;  %490 = vmatprep.mubr.bf16.mxu1 %v1718_v0  ;;  %v1408_v3 = vld [vmem:[#allocation5] ss:$16 sps:$4 sm:$0xff]   ;;  %v1409_v4 = vld [vmem:[#allocation5 + $0x8] ss:$16 sps:$4 sm:$0xff]  }
  0x70   : > { %357 = vmatprep.subr.bf16.mxu0 %v1404_v1  ;;  %458 = vmatprep.subr.bf16.mxu1 %v1406_v2  ;;  %v1410_v5 = vld [vmem:[#allocation5 + $0x24] ss:$16 sps:$4 sm:$0xff]   ;;  %v1412_v6 = vld [vmem:[#allocation5 + $0x2c] ss:$16 sps:$4 sm:$0xff]   ;;  %v1414_v7 = vld [vmem:[#allocation5 + $0x20] ss:$16 sps:$4 sm:$0xff]  }
  0x71   : > { %358 = vmatpush1.bf16.msra.mxu0 %v1408_v3  ;;  %459 = vmatpush1.bf16.msra.mxu1 %v1409_v4  ;;  %v1415_v8 = vld [vmem:[#allocation5 + $0x28] ss:$16 sps:$4 sm:$0xff]   ;;  %v243_v17 = vshrl.u32 %v242_v16, 7  ;;  %v240_v19 = vld [vmem:[#allocation7] sm:$0xf]  ;;  %s1329_s18 = smul.u32 208, %s1914_s28 }
  0x72   : > { %359 = vmatprep.subr.bf16.mxu0 %v1410_v5  ;;  %460 = vmatprep.subr.bf16.mxu1 %v1412_v6  ;;  %v1416_v9 = vld [vmem:[%s1918_s30] sm:$0xff]   ;;  %v1417_v10 = vld [vmem:[%s1918_s30 + $0x8] sm:$0xff]   ;;  %v1418_v11 = vld [vmem:[%s1918_s30 + $0x10] sm:$0xff]   ;;  %s1326_s10 = smul.u32 3328, %s1763_s16  ;;  %s1123_s23 = scalar_lea.sflag [#allocation4], %s1914_s28 }
  0x73   : > { %v1419_v12 = vld [vmem:[%s1918_s30 + $0x18] sm:$0xff]   ;;  %v1420_v13 = vld [vmem:[%s1918_s30 + $0x20] sm:$0xff]   ;;  %v1421_v14 = vld [vmem:[%s1918_s30 + $0x28] sm:$0xff]   ;;  %v244_v18 = vsub.s32 0, %v243_v17  ;;  %v252_v20 = vsub.s32 2, %v243_v17  ;;  %v248_v21 = vsub.s32 1, %v243_v17 }
  0x74   : > { %v1422_v15 = vld [vmem:[%s1918_s30 + $0x30] ss:$0 sps:$4 sm:$0xff]   ;;  %v256_v25 = vsub.s32 3, %v243_v17  ;;  %s2306_s20 = scalar_lea.vmem [#allocation8], %s1329_s18  ;;  %s2392_s27 = scalar_lea.hbm %s2443_s3, %s1326_s10 }
  0x75   : > { %360 = vmatpush1.bf16.msra.mxu0 %v1414_v7  ;;  %461 = vmatpush1.bf16.msra.mxu1 %v1415_v8  ;;  %v1949_v22 = vrot.slane %v240_v19, %v244_v18  ;;  %v1951_v23 = vrot.slane %v240_v19, %v252_v20  ;;  %v1953_v24 = vrot.slane %v240_v19, %v248_v21  ;;  %s1137_s21 = sshll.u32 %s2306_s20, 4  ;;  %p2544_p0 = scmp.ne.s32.totalorder %s2482_s6, 0  ;;  %s2394_s21 = int_to_ptr.vmem [resolvable:$true] %s1137_s21 }
  0x76   : > { %v1964_v33 = vrot.slane %v240_v19, %v256_v25  ;;  %s1639_s5 = scalar_lea.vmem %s2394_s21, 3328  ;;  %s1719_s8 = smov [#allocation8]  }
  0x77   : > { %p1640_p11 = scmp.ne.s32.totalorder %s2394_s21, %s1639_s5  ;;  %s1643_s9 = sshll.u32 %s1719_s8, 4  ;;  %s1644_s9 = int_to_ptr.vmem [resolvable:$false] %s1643_s9 }
  0x78   : > { %1253 = vmatmul.mubr.msk.bf16.vlgmr.msra.gmra.mrb[0].mxu0 %vm335_vm0, %v1416_v9  ;;  %1260 = vmatmul.mubr.msk.bf16.vlgmr.msra.gmra.mrb[0].mxu1 %vm335_vm0, %v1416_v9  ;;  %s1645_s25 = scalar_lea.vmem %s1644_s9, 6656  ;;  %p1646_p7 = scmp.lt.s32.totalorder %s2394_s21, %s1644_s9 }
  0x79   : > { %399 = vmatprep.mubr.bf16.mxu0 %v1718_v0  ;;  %500 = vmatprep.mubr.bf16.mxu1 %v1718_v0  ;;  %p1641_p1 = pnand %p1640_p11, %p2544_p0  ;;  %p1647_p9 = scmp.lt.s32.totalorder %s1645_s25, %s1639_s5 }
  0x7b   : > { %p1642_p3 = pneg %p1641_p1  ;;  %p1648_p12 = por %p1647_p9, %p1646_p7 }
  0x7d   : > { %p1649_p2 = pnand %p1648_p12, %p1642_p3 }
  0x80   : > { %1254 = vmatmul.mubr.msk.bf16.gmra.mrb[4].mxu0 %vm335_vm0, %v1417_v10  ;;  %1261 = vmatmul.mubr.msk.bf16.gmra.mrb[4].mxu1 %vm335_vm0, %v1417_v10 }
  0x81   : > { %409 = vmatprep.mubr.bf16.mxu0 %v1718_v0  ;;  %510 = vmatprep.mubr.bf16.mxu1 %v1718_v0 }
  0x88   : > { %1255 = vmatmul.mubr.msk.bf16.gmra.mrb[8].mxu0 %vm335_vm0, %v1418_v11  ;;  %1262 = vmatmul.mubr.msk.bf16.gmra.mrb[8].mxu1 %vm335_vm0, %v1418_v11 }
  0x89   : > { %419 = vmatprep.mubr.bf16.mxu0 %v1718_v0  ;;  %520 = vmatprep.mubr.bf16.mxu1 %v1718_v0 }
  0x90   : > { %1256 = vmatmul.mubr.msk.bf16.gmra.mrb[12].mxu0 %vm335_vm0, %v1419_v12  ;;  %1263 = vmatmul.mubr.msk.bf16.gmra.mrb[12].mxu1 %vm335_vm0, %v1419_v12 }
  0x91   : > { %429 = vmatprep.mubr.bf16.mxu0 %v1718_v0  ;;  %530 = vmatprep.mubr.bf16.mxu1 %v1718_v0 }
  0x98   : > { %1257 = vmatmul.mubr.msk.bf16.gmra.mrb[16].mxu0 %vm335_vm0, %v1420_v13  ;;  %1264 = vmatmul.mubr.msk.bf16.gmra.mrb[16].mxu1 %vm335_vm0, %v1420_v13 }
  0x99   : > { %439 = vmatprep.mubr.bf16.mxu0 %v1718_v0  ;;  %540 = vmatprep.mubr.bf16.mxu1 %v1718_v0 }
  0xa0   : > { %1258 = vmatmul.mubr.msk.bf16.gmra.mrb[20].mxu0 %vm335_vm0, %v1421_v14  ;;  %1265 = vmatmul.mubr.msk.bf16.gmra.mrb[20].mxu1 %vm335_vm0, %v1421_v14 }
  0xa1   : > { %449 = vmatprep.mubr.bf16.mxu0 %v1718_v0  ;;  %550 = vmatprep.mubr.bf16.mxu1 %v1718_v0 }
  0xa8   : > { %1259 = vmatmul.mubr.msk.bf16.gmra.mrb[24].mxu0 %vm335_vm0, %v1422_v15  ;;  %1266 = vmatmul.mubr.msk.bf16.gmra.mrb[24].mxu1 %vm335_vm0, %v1422_v15 }
 0x14b   : > { %v391_v26 = vpop.f32.mrb[0].mxu0  ;;  %v492_v27 = vpop.f32.mrb[0].mxu1 }
 0x14c   : > { %v1956_v28 = vadd.f32 %v391_v26, %v1949_v22  ;;  %v393_v29 = vpop.f32.mrb[1].mxu0  ;;  %v494_v30 = vpop.f32.mrb[1].mxu1  ;;  %v1959_v31 = vadd.f32 %v492_v27, %v1951_v23 }
 0x14d   : > { %v1962_v32 = vadd.f32 %v393_v29, %v1953_v24  ;;  %v395_v34 = vpop.f32.mrb[2].mxu0  ;;  %v496_v35 = vpop.f32.mrb[2].mxu1  ;;  %v1975_v41 = vadd.f32 %v494_v30, %v1964_v33 }
 0x14e   : > { %v1967_v36 = vadd.f32 %v395_v34, %v1949_v22  ;;  %v397_v37 = vpop.f32.mrb[3].mxu0  ;;  %v498_v38 = vpop.f32.mrb[3].mxu1  ;;  %v1978_v42 = vadd.f32 %v496_v35, %v1951_v23 }
 0x14f   : > { %v1970_v39 = vadd.f32 %v397_v37, %v1953_v24  ;;  %v559_v40 = vmax.f32 %v1956_v28, %v1962_v32  ;;  %v1989_v52 = vadd.f32 %v498_v38, %v1964_v33 }
 0x151   : > { %2487 = vst [vmem:[#allocation12_spill] sm:$0xff] %v1970_v39  ;;  %v564_v43 = vmax.f32 %v1967_v36, %v1970_v39  ;;  %v560_v44 = vmax.f32 %v559_v40, %v1959_v31 }
 0x153   : > { %v401_v45 = vpop.f32.mrb[4].mxu0  ;;  %v502_v46 = vpop.f32.mrb[4].mxu1  ;;  %v561_v47 = vmax.f32 %v560_v44, %v1975_v41  ;;  %v565_v48 = vmax.f32 %v564_v43, %v1978_v42 }
 0x154   : > { %v1986_v49 = vadd.f32 %v401_v45, %v1949_v22  ;;  %v403_v50 = vpop.f32.mrb[5].mxu0  ;;  %v504_v51 = vpop.f32.mrb[5].mxu1  ;;  %v1992_v53 = vadd.f32 %v502_v46, %v1951_v23 }
 0x155   : > { %v1995_v54 = vadd.f32 %v403_v50, %v1953_v24  ;;  %v405_v55 = vpop.f32.mrb[6].mxu0  ;;  %v506_v56 = vpop.f32.mrb[6].mxu1  ;;  %562 = vmax.xlane.f32.xlu0 %v561_v47  ;;  %v566_v61 = vmax.f32 %v565_v48, %v1989_v52  ;;  %v2007_v63 = vadd.f32 %v504_v51, %v1964_v33 }
 0x156   : > { %2488 = vst [vmem:[#allocation13_spill] sm:$0xff] %v1992_v53  ;;  %v1998_v57 = vadd.f32 %v405_v55, %v1949_v22  ;;  %v407_v58 = vpop.f32.mrb[7].mxu0  ;;  %v508_v59 = vpop.f32.mrb[7].mxu1  ;;  %v2010_v0 = vadd.f32 %v506_v56, %v1951_v23 }
 0x157   : > { %2489 = vst [vmem:[#allocation14_spill] sm:$0xff] %v1995_v54  ;;  %v2001_v60 = vadd.f32 %v407_v58, %v1953_v24  ;;  %v569_v62 = vmax.f32 %v1986_v49, %v1995_v54  ;;  %2492 = vst [vmem:[#allocation17_spill] sm:$0xff] %v2007_v63  ;;  %v2021_v10 = vadd.f32 %v508_v59, %v1964_v33 }
 0x158   : > { %2490 = vst [vmem:[#allocation15_spill] sm:$0xff] %v1998_v57  ;;  %2493 = vst [vmem:[#allocation18_spill] sm:$0xff] %v2010_v0 }
 0x159   : > { %2491 = vst [vmem:[#allocation16_spill] sm:$0xff] %v2001_v60  ;;  %v574_v1 = vmax.f32 %v1998_v57, %v2001_v60  ;;  %567 = vmax.xlane.f32.xlu0 %v566_v61  ;;  %v570_v2 = vmax.f32 %v569_v62, %v1992_v53  ;;  %2495 = vst [vmem:[#allocation20_spill] sm:$0xff] %v2021_v10 }
 0x15b   : > { %v411_v3 = vpop.f32.mrb[8].mxu0  ;;  %v512_v4 = vpop.f32.mrb[8].mxu1  ;;  %v571_v5 = vmax.f32 %v570_v2, %v2007_v63  ;;  %v575_v6 = vmax.f32 %v574_v1, %v2010_v0 }
 0x15c   : > { %v2018_v7 = vadd.f32 %v411_v3, %v1949_v22  ;;  %v413_v8 = vpop.f32.mrb[9].mxu0  ;;  %v514_v9 = vpop.f32.mrb[9].mxu1  ;;  %v2024_v11 = vadd.f32 %v512_v4, %v1951_v23 }
 0x15d   : > { %v2027_v12 = vadd.f32 %v413_v8, %v1953_v24  ;;  %v415_v13 = vpop.f32.mrb[10].mxu0  ;;  %v516_v14 = vpop.f32.mrb[10].mxu1  ;;  %572 = vmax.xlane.f32.xlu1 %v571_v5  ;;  %v576_v20 = vmax.f32 %v575_v6, %v2021_v10  ;;  %v2039_v21 = vadd.f32 %v514_v9, %v1964_v33 }
 0x15e   : > { %2494 = vst [vmem:[#allocation19_spill] sm:$0xff] %v2018_v7  ;;  %2496 = vst [vmem:[#allocation21_spill] sm:$0xff] %v2024_v11  ;;  %v2030_v15 = vadd.f32 %v415_v13, %v1949_v22  ;;  %v417_v16 = vpop.f32.mrb[11].mxu0  ;;  %v518_v17 = vpop.f32.mrb[11].mxu1  ;;  %v2042_v25 = vadd.f32 %v516_v14, %v1951_v23 }
 0x15f   : > { %2497 = vst [vmem:[#allocation22_spill] sm:$0xff] %v2027_v12  ;;  %v579_v18 = vmax.f32 %v2018_v7, %v2027_v12  ;;  %v2035_v19 = vadd.f32 %v417_v16, %v1953_v24  ;;  %2500 = vst [vmem:[#allocation25_spill] sm:$0xff] %v2039_v21  ;;  %v2048_v29 = vadd.f32 %v518_v17, %v1964_v33 }
 0x160   : > { %2498 = vst [vmem:[#allocation23_spill] sm:$0xff] %v2030_v15  ;;  %2501 = vst [vmem:[#allocation26_spill] sm:$0xff] %v2042_v25 }
 0x161   : > { %2499 = vst [vmem:[#allocation24_spill] sm:$0xff] %v2035_v19  ;;  %v584_v26 = vmax.f32 %v2030_v15, %v2035_v19  ;;  %577 = vmax.xlane.f32.xlu1 %v576_v20  ;;  %v580_v27 = vmax.f32 %v579_v18, %v2024_v11 }
 0x163   : > { %v421_v30 = vpop.f32.mrb[12].mxu0  ;;  %v522_v34 = vpop.f32.mrb[12].mxu1  ;;  %v581_v35 = vmax.f32 %v580_v27, %v2039_v21  ;;  %v585_v37 = vmax.f32 %v584_v26, %v2042_v25 }
 0x164   : > { %v2053_v38 = vadd.f32 %v421_v30, %v1949_v22  ;;  %v423_v40 = vpop.f32.mrb[13].mxu0  ;;  %v524_v43 = vpop.f32.mrb[13].mxu1  ;;  %v2056_v44 = vadd.f32 %v522_v34, %v1951_v23 }
 0x165   : > { %v2059_v45 = vadd.f32 %v423_v40, %v1953_v24  ;;  %v425_v46 = vpop.f32.mrb[14].mxu0  ;;  %v526_v47 = vpop.f32.mrb[14].mxu1  ;;  %582 = vmax.xlane.f32.xlu0 %v581_v35  ;;  %v586_v48 = vmax.f32 %v585_v37, %v2048_v29  ;;  %v2071_v59 = vadd.f32 %v524_v43, %v1964_v33 }
 0x166   : > { %v2063_v50 = vadd.f32 %v425_v46, %v1949_v22  ;;  %v427_v51 = vpop.f32.mrb[15].mxu0  ;;  %v528_v55 = vpop.f32.mrb[15].mxu1  ;;  %v2074_v61 = vadd.f32 %v526_v47, %v1951_v23 }
 0x167   : > { %v589_v56 = vmax.f32 %v2053_v38, %v2059_v45  ;;  %v2068_v58 = vadd.f32 %v427_v51, %v1953_v24  ;;  %587 = vmax.xlane.f32.xlu1 %v586_v48  ;;  %v2080_v2 = vadd.f32 %v528_v55, %v1964_v33 }
 0x168   : > { %2503 = vst [vmem:[#allocation28_spill] sm:$0xff] %v2074_v61 }
 0x169   : > { %2502 = vst [vmem:[#allocation27_spill] sm:$0xff] %v2068_v58  ;;  %v594_v62 = vmax.f32 %v2063_v50, %v2068_v58  ;;  %v590_v1 = vmax.f32 %v589_v56, %v2056_v44 }
 0x16b   : > { %v431_v3 = vpop.f32.mrb[16].mxu0  ;;  %v532_v4 = vpop.f32.mrb[16].mxu1  ;;  %v591_v5 = vmax.f32 %v590_v1, %v2071_v59  ;;  %v595_v6 = vmax.f32 %v594_v62, %v2074_v61 }
 0x16c   : > { %v2085_v8 = vadd.f32 %v431_v3, %v1949_v22  ;;  %v433_v9 = vpop.f32.mrb[17].mxu0  ;;  %v534_v13 = vpop.f32.mrb[17].mxu1  ;;  %v2088_v14 = vadd.f32 %v532_v4, %v1951_v23 }
 0x16d   : > { %v2091_v16 = vadd.f32 %v433_v9, %v1953_v24  ;;  %v435_v17 = vpop.f32.mrb[18].mxu0  ;;  %v536_v18 = vpop.f32.mrb[18].mxu1  ;;  %592 = vmax.xlane.f32.xlu0 %v591_v5  ;;  %v596_v20 = vmax.f32 %v595_v6, %v2080_v2  ;;  %v2103_v37 = vadd.f32 %v534_v13, %v1964_v33 }
 0x16e   : > { %v2095_v26 = vadd.f32 %v435_v17, %v1949_v22  ;;  %v437_v27 = vpop.f32.mrb[19].mxu0  ;;  %v538_v30 = vpop.f32.mrb[19].mxu1  ;;  %v2106_v40 = vadd.f32 %v536_v18, %v1951_v23 }
 0x16f   : > { %v599_v34 = vmax.f32 %v2085_v8, %v2091_v16  ;;  %v2100_v35 = vadd.f32 %v437_v27, %v1953_v24  ;;  %597 = vmax.xlane.f32.xlu1 %v596_v20  ;;  %v2112_v47 = vadd.f32 %v538_v30, %v1964_v33 }
 0x170   : > { %2505 = vst [vmem:[#allocation30_spill] sm:$0xff] %v2106_v40 }
 0x171   : > { %2504 = vst [vmem:[#allocation29_spill] sm:$0xff] %v2100_v35  ;;  %v604_v43 = vmax.f32 %v2095_v26, %v2100_v35  ;;  %v600_v46 = vmax.f32 %v599_v34, %v2088_v14 }
 0x173   : > { %v441_v48 = vpop.f32.mrb[20].mxu0  ;;  %v542_v51 = vpop.f32.mrb[20].mxu1  ;;  %v601_v55 = vmax.f32 %v600_v46, %v2103_v37  ;;  %v605_v56 = vmax.f32 %v604_v43, %v2106_v40 }
 0x174   : > { %v2117_v62 = vadd.f32 %v441_v48, %v1949_v22  ;;  %v443_v1 = vpop.f32.mrb[21].mxu0  ;;  %v544_v3 = vpop.f32.mrb[21].mxu1  ;;  %v2120_v4 = vadd.f32 %v542_v51, %v1951_v23 }
 0x175   : > { %v2123_v5 = vadd.f32 %v443_v1, %v1953_v24  ;;  %v445_v6 = vpop.f32.mrb[22].mxu0  ;;  %v546_v9 = vpop.f32.mrb[22].mxu1  ;;  %602 = vmax.xlane.f32.xlu0 %v601_v55  ;;  %v606_v13 = vmax.f32 %v605_v56, %v2112_v47  ;;  %v2135_v34 = vadd.f32 %v544_v3, %v1964_v33 }
 0x176   : > { %2506 = vst [vmem:[#allocation31_spill] sm:$0xff] %v2120_v4  ;;  %v2127_v17 = vadd.f32 %v445_v6, %v1949_v22  ;;  %v447_v18 = vpop.f32.mrb[23].mxu0  ;;  %v548_v20 = vpop.f32.mrb[23].mxu1  ;;  %v2138_v43 = vadd.f32 %v546_v9, %v1951_v23 }
 0x177   : > { %v609_v27 = vmax.f32 %v2117_v62, %v2123_v5  ;;  %v2132_v30 = vadd.f32 %v447_v18, %v1953_v24  ;;  %607 = vmax.xlane.f32.xlu1 %v606_v13  ;;  %2509 = vst [vmem:[#allocation34_spill] sm:$0xff] %v2135_v34  ;;  %v2144_v51 = vadd.f32 %v548_v20, %v1964_v33 }
 0x178   : > { %2507 = vst [vmem:[#allocation32_spill] sm:$0xff] %v2127_v17  ;;  %2510 = vst [vmem:[#allocation35_spill] sm:$0xff] %v2138_v43 }
 0x179   : > { %2508 = vst [vmem:[#allocation33_spill] sm:$0xff] %v2132_v30  ;;  %v614_v46 = vmax.f32 %v2127_v17, %v2132_v30  ;;  %v610_v48 = vmax.f32 %v609_v27, %v2120_v4 }
 0x17b   : > { %v451_v55 = vpop.f32.mrb[24].mxu0  ;;  %v552_v56 = vpop.f32.mrb[24].mxu1  ;;  %v611_v1 = vmax.f32 %v610_v48, %v2135_v34  ;;  %v615_v6 = vmax.f32 %v614_v46, %v2138_v43 }
 0x17c   : > { %v2149_v3 = vadd.f32 %v451_v55, %v1949_v22  ;;  %v453_v13 = vpop.f32.mrb[25].mxu0  ;;  %v554_v9 = vpop.f32.mrb[25].mxu1  ;;  %v2152_v18 = vadd.f32 %v552_v56, %v1951_v23 }
 0x17d   : > { %v2155_v30 = vadd.f32 %v453_v13, %v1953_v24  ;;  %v455_v27 = vpop.f32.mrb[26].mxu0  ;;  %v556_v20 = vpop.f32.mrb[26].mxu1  ;;  %612 = vmax.xlane.f32.xlu0 %v611_v1  ;;  %v616_v17 = vmax.f32 %v615_v6, %v2144_v51  ;;  %v2161_v22 = vadd.f32 %v554_v9, %v1964_v33 }
 0x17e   : > { %v456_v4 = vpop.f32.mrb[27].mxu0  ;;  %v557_v48 = vpop.f32.mrb[27].mxu1 }
 0x17f   : > { %v619_v46 = vmax.f32 %v2149_v3, %v2155_v30  ;;  %617 = vmax.xlane.f32.xlu1 %v616_v17  ;;  %2511 = vst [vmem:[#allocation36_spill] sm:$0xff] %v2161_v22 }
 0x181   : > { %v620_v23 = vmax.f32 %v619_v46, %v2152_v18 }
 0x183   : > { %v621_v55 = vmax.f32 %v620_v23, %v2161_v22 }
 0x185   : > { %622 = vmax.xlane.f32.xlu0 %v621_v55 }
 0x1e2   : > { %v2165_v24 = vpop.xlane.xlu0 %562 }
 0x1e3   : > { %v624_v56 = vsub.f32 %v1956_v28, %v2165_v24  ;;  %v625_v4 = vsub.f32 %v1962_v32, %v2165_v24  ;;  %v626_v1 = vsub.f32 %v1959_v31, %v2165_v24  ;;  %v627_v33 = vsub.f32 %v1975_v41, %v2165_v24 }
 0x1e5   : > { %v676_v17 = vmul.f32 1.442695, %v624_v56  ;;  %v678_v6 = vmul.f32 1.442695, %v625_v4  ;;  %v680_v13 = vmul.f32 1.442695, %v626_v1 }
 0x1e6   : > { %v682_v9 = vmul.f32 1.442695, %v627_v33  ;;  %v2175_v27 = vpop.xlane.xlu0 %567 }
 0x1e7   : > { %1423 = vpow2.f32 %v676_v17  ;;  %v628_v20 = vsub.f32 %v1967_v36, %v2175_v27  ;;  %v629_v48 = vsub.f32 %v1970_v39, %v2175_v27  ;;  %v630_v46 = vsub.f32 %v1978_v42, %v2175_v27 }
 0x1e8   : > { %1425 = vpow2.f32 %v678_v6  ;;  %v631_v23 = vsub.f32 %v1989_v52, %v2175_v27 }
 0x1e9   : > { %1427 = vpow2.f32 %v680_v13  ;;  %v684_v55 = vmul.f32 1.442695, %v628_v20  ;;  %v686_v56 = vmul.f32 1.442695, %v629_v48  ;;  %v688_v4 = vmul.f32 1.442695, %v630_v46 }
 0x1ea   : > { %1429 = vpow2.f32 %v682_v9  ;;  %v690_v1 = vmul.f32 1.442695, %v631_v23  ;;  %v2185_v33 = vpop.xlane.xlu1 %572 }
 0x1eb   : > { %1431 = vpow2.f32 %v684_v55  ;;  %v632_v17 = vsub.f32 %v1986_v49, %v2185_v33  ;;  %v633_v39 = vsub.f32 %v1995_v54, %v2185_v33  ;;  %v634_v6 = vsub.f32 %v1992_v53, %v2185_v33 }
 0x1ec   : > { %1433 = vpow2.f32 %v686_v56  ;;  %v635_v13 = vsub.f32 %v2007_v63, %v2185_v33 }
 0x1ed   : > { %1435 = vpow2.f32 %v688_v4  ;;  %v692_v20 = vmul.f32 1.442695, %v632_v17  ;;  %v694_v9 = vmul.f32 1.442695, %v633_v39  ;;  %v696_v48 = vmul.f32 1.442695, %v634_v6 }
 0x1ee   : > { %1437 = vpow2.f32 %v690_v1  ;;  %v698_v46 = vmul.f32 1.442695, %v635_v13  ;;  %v2195_v23 = vpop.xlane.xlu1 %577 }
 0x1ef   : > { %2512 = vst [vmem:[#allocation37_spill] sm:$0xff] %v2195_v23  ;;  %1439 = vpow2.f32 %v692_v20  ;;  %v636_v55 = vsub.f32 %v1998_v57, %v2195_v23  ;;  %v637_v54 = vsub.f32 %v2001_v60, %v2195_v23  ;;  %v638_v56 = vsub.f32 %v2010_v0, %v2195_v23 }
 0x1f0   : > { %1441 = vpow2.f32 %v694_v9  ;;  %v639_v4 = vsub.f32 %v2021_v10, %v2195_v23 }
 0x1f1   : > { %v1424_v39 = vpop.eup %1423  ;;  %1443 = vpow2.f32 %v696_v48  ;;  %v700_v1 = vmul.f32 1.442695, %v636_v55  ;;  %v702_v17 = vmul.f32 1.442695, %v637_v54  ;;  %v704_v6 = vmul.f32 1.442695, %v638_v56 }
 0x1f2   : > { %v1426_v13 = vpop.eup %1425  ;;  %1445 = vpow2.f32 %v698_v46  ;;  %v706_v20 = vmul.f32 1.442695, %v639_v4  ;;  %v2205_v63 = vpop.xlane.xlu0 %582 }
 0x1f3   : > { %2513 = vst [vmem:[#allocation38_spill] sm:$0xff] %v2205_v63  ;;  %v1428_v57 = vpop.eup %1427  ;;  %1447 = vpow2.f32 %v700_v1  ;;  %v640_v60 = vsub.f32 %v2018_v7, %v2205_v63  ;;  %v641_v9 = vsub.f32 %v2027_v12, %v2205_v63  ;;  %v642_v10 = vsub.f32 %v2024_v11, %v2205_v63 }
 0x1f4   : > { %v1430_v48 = vpop.eup %1429  ;;  %1449 = vpow2.f32 %v702_v17  ;;  %v643_v54 = vsub.f32 %v2039_v21, %v2205_v63  ;;  %v2215_v46 = vpop.xlane.xlu1 %587  ;;  %v780_v55 = vadd.f32 %v1426_v13, %v1424_v39 }
 0x1f5   : > { %v1432_v56 = vpop.eup %1431  ;;  %1451 = vpow2.f32 %v704_v6  ;;  %v708_v4 = vmul.f32 1.442695, %v640_v60  ;;  %v710_v1 = vmul.f32 1.442695, %v641_v9  ;;  %v712_v0 = vmul.f32 1.442695, %v642_v10 }
 0x1f6   : > { %v1434_v7 = vpop.eup %1433  ;;  %1453 = vpow2.f32 %v706_v20  ;;  %v714_v23 = vmul.f32 1.442695, %v643_v54  ;;  %v644_v12 = vsub.f32 %v2030_v15, %v2215_v46  ;;  %v645_v17 = vsub.f32 %v2035_v19, %v2215_v46 }
 0x1f7   : > { %v1436_v11 = vpop.eup %1435  ;;  %1455 = vpow2.f32 %v708_v4  ;;  %v646_v21 = vsub.f32 %v2042_v25, %v2215_v46  ;;  %v647_v39 = vsub.f32 %v2048_v29, %v2215_v46  ;;  %v781_v60 = vadd.f32 %v1428_v57, %v780_v55 }
 0x1f8   : > { %v1438_v6 = vpop.eup %1437  ;;  %1457 = vpow2.f32 %v710_v1  ;;  %v716_v10 = vmul.f32 1.442695, %v644_v12  ;;  %v718_v13 = vmul.f32 1.442695, %v645_v17  ;;  %v785_v20 = vadd.f32 %v1434_v7, %v1432_v56 }
 0x1f9   : > { %v1440_v9 = vpop.eup %1439  ;;  %1459 = vpow2.f32 %v712_v0  ;;  %v720_v54 = vmul.f32 1.442695, %v646_v21  ;;  %v782_v15 = vadd.f32 %v1430_v48, %v781_v60  ;;  %v722_v19 = vmul.f32 1.442695, %v647_v39 }
 0x1fa   : > { %v1442_v63 = vpop.eup %1441  ;;  %1461 = vpow2.f32 %v714_v23  ;;  %v2225_v4 = vpop.xlane.xlu0 %592  ;;  %v786_v53 = vadd.f32 %v1436_v11, %v785_v20 }
 0x1fb   : > { %v1444_v25 = vpop.eup %1443  ;;  %1463 = vpow2.f32 %v716_v10  ;;  %783 = vadd.xlane.f32.xlu1 %v782_v15  ;;  %v648_v57 = vsub.f32 %v2053_v38, %v2225_v4  ;;  %v649_v12 = vsub.f32 %v2059_v45, %v2225_v4  ;;  %v650_v0 = vsub.f32 %v2056_v44, %v2225_v4 }
 0x1fc   : > { %v1446_v7 = vpop.eup %1445  ;;  %1465 = vpow2.f32 %v718_v13  ;;  %v651_v21 = vsub.f32 %v2071_v59, %v2225_v4  ;;  %v2235_v23 = vpop.xlane.xlu1 %597  ;;  %v787_v11 = vadd.f32 %v1438_v6, %v786_v53  ;;  %v790_v48 = vadd.f32 %v1442_v63, %v1440_v9 }
 0x1fd   : > { %v1448_v55 = vpop.eup %1447  ;;  %1467 = vpow2.f32 %v720_v54  ;;  %v724_v15 = vmul.f32 1.442695, %v648_v57  ;;  %v726_v56 = vmul.f32 1.442695, %v649_v12  ;;  %v728_v1 = vmul.f32 1.442695, %v650_v0 }
 0x1fe   : > { %v1450_v17 = vpop.eup %1449  ;;  %1469 = vpow2.f32 %v722_v19  ;;  %v730_v39 = vmul.f32 1.442695, %v651_v21  ;;  %v652_v60 = vsub.f32 %v2063_v50, %v2235_v23  ;;  %v653_v10 = vsub.f32 %v2068_v58, %v2235_v23  ;;  %788 = vadd.xlane.f32.xlu0 %v787_v11 }
 0x1ff   : > { %v1452_v13 = vpop.eup %1451  ;;  %1471 = vpow2.f32 %v724_v15  ;;  %v654_v53 = vsub.f32 %v2074_v61, %v2235_v23  ;;  %v655_v63 = vsub.f32 %v2080_v2, %v2235_v23  ;;  %v791_v6 = vadd.f32 %v1444_v25, %v790_v48 }
 0x200   : > { %v1454_v20 = vpop.eup %1453  ;;  %1473 = vpow2.f32 %v726_v56  ;;  %v732_v19 = vmul.f32 1.442695, %v652_v60  ;;  %v734_v9 = vmul.f32 1.442695, %v653_v10  ;;  %v795_v54 = vadd.f32 %v1450_v17, %v1448_v55 }
 0x201   : > { %v1456_v57 = vpop.eup %1455  ;;  %1475 = vpow2.f32 %v728_v1  ;;  %v736_v12 = vmul.f32 1.442695, %v654_v53  ;;  %v792_v0 = vadd.f32 %v1446_v7, %v791_v6  ;;  %v738_v11 = vmul.f32 1.442695, %v655_v63 }
 0x202   : > { %v1458_v21 = vpop.eup %1457  ;;  %1477 = vpow2.f32 %v730_v39  ;;  %v2245_v15 = vpop.xlane.xlu0 %602  ;;  %v796_v58 = vadd.f32 %v1452_v13, %v795_v54 }
 0x203   : > { %v1460_v61 = vpop.eup %1459  ;;  %1479 = vpow2.f32 %v732_v19  ;;  %793 = vadd.xlane.f32.xlu1 %v792_v0  ;;  %v656_v25 = vsub.f32 %v2085_v8, %v2245_v15  ;;  %v657_v48 = vsub.f32 %v2091_v16, %v2245_v15  ;;  %v658_v55 = vsub.f32 %v2088_v14, %v2245_v15 }
 0x204   : > { %v1462_v56 = vpop.eup %1461  ;;  %1481 = vpow2.f32 %v734_v9  ;;  %v659_v7 = vsub.f32 %v2103_v37, %v2245_v15  ;;  %v2255_v1 = vpop.xlane.xlu1 %607  ;;  %v797_v17 = vadd.f32 %v1454_v20, %v796_v58  ;;  %v800_v39 = vadd.f32 %v1458_v21, %v1456_v57 }
 0x205   : > { %v1464_v60 = vpop.eup %1463  ;;  %1483 = vpow2.f32 %v736_v12  ;;  %v740_v10 = vmul.f32 1.442695, %v656_v25  ;;  %v742_v13 = vmul.f32 1.442695, %v657_v48  ;;  %v744_v53 = vmul.f32 1.442695, %v658_v55 }
 0x206   : > { %v1466_v63 = vpop.eup %1465  ;;  %1485 = vpow2.f32 %v738_v11  ;;  %v746_v6 = vmul.f32 1.442695, %v659_v7  ;;  %v660_v19 = vsub.f32 %v2095_v26, %v2255_v1  ;;  %v661_v9 = vsub.f32 %v2100_v35, %v2255_v1  ;;  %798 = vadd.xlane.f32.xlu0 %v797_v17 }
 0x207   : > { %v1468_v54 = vpop.eup %1467  ;;  %1487 = vpow2.f32 %v740_v10  ;;  %v662_v58 = vsub.f32 %v2106_v40, %v2255_v1  ;;  %v663_v20 = vsub.f32 %v2112_v47, %v2255_v1  ;;  %v801_v57 = vadd.f32 %v1460_v61, %v800_v39 }
 0x208   : > { %v1470_v12 = vpop.eup %1469  ;;  %1489 = vpow2.f32 %v742_v13  ;;  %v748_v0 = vmul.f32 1.442695, %v660_v19  ;;  %v750_v21 = vmul.f32 1.442695, %v661_v9  ;;  %v805_v11 = vadd.f32 %v1466_v63, %v1464_v60  ;;  %v2514_v60 = vld [vmem:[#allocation31_spill] sm:$0xff] }
 0x209   : > { %v1472_v25 = vpop.eup %1471  ;;  %1491 = vpow2.f32 %v744_v53  ;;  %v752_v48 = vmul.f32 1.442695, %v662_v58  ;;  %v802_v55 = vadd.f32 %v1462_v56, %v801_v57  ;;  %v754_v17 = vmul.f32 1.442695, %v663_v20 }
 0x20a   : > { %v1474_v7 = vpop.eup %1473  ;;  %1493 = vpow2.f32 %v746_v6  ;;  %v806_v10 = vadd.f32 %v1468_v54, %v805_v11  ;;  %v2265_v35 = vpop.xlane.xlu0 %612  ;;  %v2515_v11 = vld [vmem:[#allocation32_spill] sm:$0xff] }
 0x20b   : > { %v1476_v40 = vpop.eup %1475  ;;  %1495 = vpow2.f32 %v748_v0  ;;  %803 = vadd.xlane.f32.xlu1 %v802_v55  ;;  %v664_v61 = vsub.f32 %v2117_v62, %v2265_v35  ;;  %v665_v39 = vsub.f32 %v2123_v5, %v2265_v35  ;;  %v666_v13 = vsub.f32 %v2514_v60, %v2265_v35 }
 0x20c   : > { %v1478_v53 = vpop.eup %1477  ;;  %1497 = vpow2.f32 %v750_v21  ;;  %v807_v56 = vadd.f32 %v1470_v12, %v806_v10  ;;  %v667_v63 = vsub.f32 %v2135_v34, %v2265_v35  ;;  %v2275_v6 = vpop.xlane.xlu1 %617  ;;  %v810_v19 = vadd.f32 %v1474_v7, %v1472_v25  ;;  %v2516_v12 = vld [vmem:[#allocation33_spill] sm:$0xff] }
 0x20d   : > { %v1480_v9 = vpop.eup %1479  ;;  %1499 = vpow2.f32 %v752_v48  ;;  %v756_v54 = vmul.f32 1.442695, %v664_v61  ;;  %v758_v58 = vmul.f32 1.442695, %v665_v39  ;;  %v760_v20 = vmul.f32 1.442695, %v666_v13 }
 0x20e   : > { %v1482_v57 = vpop.eup %1481  ;;  %1501 = vpow2.f32 %v754_v17  ;;  %808 = vadd.xlane.f32.xlu0 %v807_v56  ;;  %v762_v0 = vmul.f32 1.442695, %v667_v63  ;;  %v668_v55 = vsub.f32 %v2515_v11, %v2275_v6  ;;  %v669_v21 = vsub.f32 %v2516_v12, %v2275_v6 }
 0x20f   : > { %v1484_v10 = vpop.eup %1483  ;;  %1503 = vpow2.f32 %v756_v54  ;;  %v670_v25 = vsub.f32 %v2138_v43, %v2275_v6  ;;  %v671_v48 = vsub.f32 %v2144_v51, %v2275_v6  ;;  %v811_v7 = vadd.f32 %v1476_v40, %v810_v19 }
 0x210   : > { %v1486_v61 = vpop.eup %1485  ;;  %1505 = vpow2.f32 %v758_v58  ;;  %v764_v17 = vmul.f32 1.442695, %v668_v55  ;;  %v766_v39 = vmul.f32 1.442695, %v669_v21  ;;  %v815_v13 = vadd.f32 %v1482_v57, %v1480_v9 }
 0x211   : > { %v1488_v56 = vpop.eup %1487  ;;  %1507 = vpow2.f32 %v760_v20  ;;  %v768_v63 = vmul.f32 1.442695, %v670_v25  ;;  %v812_v11 = vadd.f32 %v1478_v53, %v811_v7  ;;  %v770_v12 = vmul.f32 1.442695, %v671_v48 }
 0x212   : > { %v1490_v34 = vpop.eup %1489  ;;  %1509 = vpow2.f32 %v762_v0  ;;  %v816_v54 = vadd.f32 %v1484_v10, %v815_v13  ;;  %v2285_v60 = vpop.xlane.xlu0 %622 }
 0x213   : > { %v1492_v43 = vpop.eup %1491  ;;  %1511 = vpow2.f32 %v764_v17  ;;  %813 = vadd.xlane.f32.xlu1 %v812_v11  ;;  %v672_v40 = vsub.f32 %v2149_v3, %v2285_v60  ;;  %v673_v19 = vsub.f32 %v2155_v30, %v2285_v60  ;;  %v674_v9 = vsub.f32 %v2152_v18, %v2285_v60 }
 0x214   : > { %v1494_v58 = vpop.eup %1493  ;;  %1513 = vpow2.f32 %v766_v39  ;;  %v817_v53 = vadd.f32 %v1486_v61, %v816_v54  ;;  %v675_v20 = vsub.f32 %v2161_v22, %v2285_v60  ;;  %v820_v57 = vadd.f32 %v1490_v34, %v1488_v56 }
 0x215   : > { %v1496_v0 = vpop.eup %1495  ;;  %1515 = vpow2.f32 %v768_v63  ;;  %v772_v55 = vmul.f32 1.442695, %v672_v40  ;;  %v774_v11 = vmul.f32 1.442695, %v673_v19  ;;  %v776_v10 = vmul.f32 1.442695, %v674_v9 }
 0x216   : > { %v1498_v21 = vpop.eup %1497  ;;  %1517 = vpow2.f32 %v770_v12  ;;  %818 = vadd.xlane.f32.xlu0 %v817_v53  ;;  %v821_v25 = vadd.f32 %v1492_v43, %v820_v57  ;;  %v778_v39 = vmul.f32 1.442695, %v675_v20 }
 0x217   : > { %v1500_v48 = vpop.eup %1499  ;;  %1519 = vpow2.f32 %v772_v55  ;;  %v825_v7 = vadd.f32 %v1498_v21, %v1496_v0 }
 0x218   : > { %v1502_v17 = vpop.eup %1501  ;;  %1521 = vpow2.f32 %v774_v11  ;;  %v822_v61 = vadd.f32 %v1494_v58, %v821_v25 }
 0x219   : > { %v1504_v13 = vpop.eup %1503  ;;  %v826_v54 = vadd.f32 %v1500_v48, %v825_v7  ;;  %1523 = vpow2.f32 %v776_v10 }
 0x21a   : > { %v1506_v22 = vpop.eup %1505  ;;  %823 = vadd.xlane.f32.xlu1 %v822_v61  ;;  %1525 = vpow2.f32 %v778_v39 }
 0x21b   : > { %v1508_v34 = vpop.eup %1507  ;;  %v827_v56 = vadd.f32 %v1502_v17, %v826_v54  ;;  %v830_v63 = vadd.f32 %v1506_v22, %v1504_v13 }
 0x21c   : > { %v1510_v40 = vpop.eup %1509 }
 0x21d   : > { %v1512_v12 = vpop.eup %1511  ;;  %828 = vadd.xlane.f32.xlu0 %v827_v56  ;;  %v831_v43 = vadd.f32 %v1508_v34, %v830_v63 }
 0x21e   : > { %v1514_v19 = vpop.eup %1513 }
 0x21f   : > { %v1516_v9 = vpop.eup %1515  ;;  %v832_v53 = vadd.f32 %v1510_v40, %v831_v43  ;;  %v835_v57 = vadd.f32 %v1514_v19, %v1512_v12 }
 0x220   : > { %v1518_v0 = vpop.eup %1517 }
 0x221   : > { %v1520_v20 = vpop.eup %1519  ;;  %833 = vadd.xlane.f32.xlu1 %v832_v53  ;;  %v836_v58 = vadd.f32 %v1516_v9, %v835_v57 }
 0x222   : > { %v1522_v55 = vpop.eup %1521 }
 0x223   : > { %v837_v11 = vadd.f32 %v1518_v0, %v836_v58  ;;  %v840_v21 = vadd.f32 %v1522_v55, %v1520_v20  ;;  %v1524_v10 = vpop.eup %1523  ;;  %v2517_v55 = vld [vmem:[#allocation12_spill] sm:$0xff] }
 0x224   : > { %v1526_v25 = vpop.eup %1525 }
 0x225   : > { %838 = vadd.xlane.f32.xlu0 %v837_v11  ;;  %v841_v22 = vadd.f32 %v1524_v10, %v840_v21  ;;  %v2518_v10 = vld [vmem:[#allocation14_spill] sm:$0xff] }
 0x227   : > { %v842_v48 = vadd.f32 %v1526_v25, %v841_v22  ;;  %v2519_v25 = vld [vmem:[#allocation13_spill] sm:$0xff] }
 0x229   : > { %843 = vadd.xlane.f32.xlu1 %v842_v48 }
 0x288   : > { %v784_v7 = vpop.xlane.xlu1 %783 }
 0x289   : > { %1527 = vlog2.f32 %v784_v7  ;;  %v2520_v7 = vld [vmem:[#allocation17_spill] sm:$0xff] }
 0x28b   : > { %v789_v17 = vpop.xlane.xlu0 %788 }
 0x28c   : > { %1529 = vlog2.f32 %v789_v17 }
 0x290   : > { %v794_v39 = vpop.xlane.xlu1 %793 }
 0x291   : > { %1531 = vlog2.f32 %v794_v39 }
 0x293   : > { %v1528_v61 = vpop.eup %1527  ;;  %v799_v13 = vpop.xlane.xlu0 %798 }
 0x294   : > { %v846_v54 = vmul.f32 0.6931472, %v1528_v61  ;;  %1533 = vlog2.f32 %v799_v13  ;;  %v2521_v61 = vld [vmem:[#allocation37_spill] sm:$0xff] }
 0x296   : > { %v1530_v34 = vpop.eup %1529  ;;  %v871_v56 = vadd.f32 %v846_v54, %v2165_v24 }
 0x297   : > { %v848_v63 = vmul.f32 0.6931472, %v1530_v34 }
 0x298   : > { %v884_v40 = vsub.f32 %v1956_v28, %v871_v56  ;;  %v885_v12 = vsub.f32 %v1962_v32, %v871_v56  ;;  %v886_v43 = vsub.f32 %v1959_v31, %v871_v56  ;;  %v887_v19 = vsub.f32 %v1975_v41, %v871_v56  ;;  %v804_v9 = vpop.xlane.xlu1 %803  ;;  %v2522_v56 = vld [vmem:[#allocation15_spill] sm:$0xff] }
 0x299   : > { %v872_v53 = vadd.f32 %v848_v63, %v2175_v27  ;;  %1535 = vlog2.f32 %v804_v9 }
 0x29a   : > { %v1298_v57 = vpack.c.bf16 %v885_v12, %v884_v40  ;;  %v1299_v0 = vpack.c.bf16 %v887_v19, %v886_v43  ;;  %v2523_v40 = vld [vmem:[#allocation16_spill] sm:$0xff]  ;;  %v2524_v12 = vld [vmem:[#allocation18_spill] sm:$0xff] }
 0x29b   : > { %v1532_v20 = vpop.eup %1531  ;;  %v888_v58 = vsub.f32 %v1967_v36, %v872_v53  ;;  %v889_v24 = vsub.f32 %v2517_v55, %v872_v53  ;;  %v890_v11 = vsub.f32 %v1978_v42, %v872_v53  ;;  %v891_v28 = vsub.f32 %v1989_v52, %v872_v53  ;;  %v809_v32 = vpop.xlane.xlu0 %808  ;;  %v2525_v19 = vld [vmem:[#allocation20_spill] sm:$0xff]  ;;  %v2526_v55 = vld [vmem:[#allocation38_spill] sm:$0xff] }
 0x29c   : > { %1096 = vst [vmem:[%s2306_s20] sm:$0xff] %v1298_v57  ;;  %1097 = vst [vmem:[%s2306_s20 + $0x8] sm:$0xff] %v1299_v0  ;;  %v850_v31 = vmul.f32 0.6931472, %v1532_v20  ;;  %1537 = vlog2.f32 %v809_v32  ;;  %v2527_v32 = vld [vmem:[#allocation19_spill] sm:$0xff] }
 0x29d   : > { %v1300_v41 = vpack.c.bf16 %v889_v24, %v888_v58  ;;  %v1301_v27 = vpack.c.bf16 %v891_v28, %v890_v11 }
 0x29e   : > { %v1534_v36 = vpop.eup %1533  ;;  %v873_v21 = vadd.f32 %v850_v31, %v2185_v33 }
 0x29f   : > { %1098 = vst [vmem:[%s2306_s20 + $0x10] sm:$0xff] %v1300_v41  ;;  %1099 = vst [vmem:[%s2306_s20 + $0x18] sm:$0xff] %v1301_v27  ;;  %v852_v42 = vmul.f32 0.6931472, %v1534_v36  ;;  %v2528_v41 = vld [vmem:[#allocation22_spill] sm:$0xff]  ;;  %v2529_v36 = vld [vmem:[#allocation21_spill] sm:$0xff] }
 0x2a0   : > { %v892_v52 = vsub.f32 %v1986_v49, %v873_v21  ;;  %v893_v22 = vsub.f32 %v2518_v10, %v873_v21  ;;  %v894_v48 = vsub.f32 %v2519_v25, %v873_v21  ;;  %v895_v17 = vsub.f32 %v2520_v7, %v873_v21  ;;  %v814_v39 = vpop.xlane.xlu1 %813 }
 0x2a1   : > { %v874_v13 = vadd.f32 %v852_v42, %v2521_v61  ;;  %1539 = vlog2.f32 %v814_v39  ;;  %v2530_v42 = vld [vmem:[#allocation25_spill] sm:$0xff]  ;;  %v2532_v61 = vld [vmem:[#allocation24_spill] sm:$0xff] }
 0x2a2   : > { %v1302_v54 = vpack.c.bf16 %v893_v22, %v892_v52  ;;  %v1303_v33 = vpack.c.bf16 %v895_v17, %v894_v48  ;;  %v2531_v17 = vld [vmem:[#allocation23_spill] sm:$0xff] }
 0x2a3   : > { %v1536_v34 = vpop.eup %1535  ;;  %v896_v63 = vsub.f32 %v2522_v56, %v874_v13  ;;  %v897_v49 = vsub.f32 %v2523_v40, %v874_v13  ;;  %v898_v43 = vsub.f32 %v2524_v12, %v874_v13  ;;  %v899_v9 = vsub.f32 %v2525_v19, %v874_v13  ;;  %v819_v53 = vpop.xlane.xlu0 %818 }
 0x2a4   : > { %1100 = vst [vmem:[%s2306_s20 + $0x20] sm:$0xff] %v1302_v54  ;;  %1101 = vst [vmem:[%s2306_s20 + $0x28] sm:$0xff] %v1303_v33  ;;  %v854_v57 = vmul.f32 0.6931472, %v1536_v34  ;;  %1541 = vlog2.f32 %v819_v53  ;;  %v2533_v54 = vld [vmem:[#allocation26_spill] sm:$0xff] }
 0x2a5   : > { %v1304_v0 = vpack.c.bf16 %v897_v49, %v896_v63  ;;  %v1305_v20 = vpack.c.bf16 %v899_v9, %v898_v43 }
 0x2a6   : > { %v1538_v58 = vpop.eup %1537  ;;  %v875_v24 = vadd.f32 %v854_v57, %v2526_v55 }
 0x2a7   : > { %1102 = vst [vmem:[%s2306_s20 + $0x30] sm:$0xff] %v1304_v0  ;;  %1103 = vst [vmem:[%s2306_s20 + $0x38] sm:$0xff] %v1305_v20  ;;  %v856_v11 = vmul.f32 0.6931472, %v1538_v58  ;;  %v824_v28 = vpop.xlane.xlu1 %823 }
 0x2a8   : > { %v900_v31 = vsub.f32 %v2527_v32, %v875_v24  ;;  %v901_v27 = vsub.f32 %v2528_v41, %v875_v24  ;;  %v902_v21 = vsub.f32 %v2529_v36, %v875_v24  ;;  %v903_v52 = vsub.f32 %v2530_v42, %v875_v24  ;;  %v2534_v24 = vld [vmem:[#allocation27_spill] sm:$0xff] }
 0x2a9   : > { %v876_v10 = vadd.f32 %v856_v11, %v2215_v46  ;;  %1543 = vlog2.f32 %v824_v28  ;;  %v2535_v28 = vld [vmem:[#allocation28_spill] sm:$0xff] }
 0x2aa   : > { %v1306_v22 = vpack.c.bf16 %v901_v27, %v900_v31  ;;  %v1307_v25 = vpack.c.bf16 %v903_v52, %v902_v21  ;;  %v829_v48 = vpop.xlane.xlu0 %828 }
 0x2ab   : > { %v1540_v7 = vpop.eup %1539  ;;  %v904_v39 = vsub.f32 %v2531_v17, %v876_v10  ;;  %v905_v13 = vsub.f32 %v2532_v61, %v876_v10  ;;  %v906_v33 = vsub.f32 %v2533_v54, %v876_v10  ;;  %v907_v34 = vsub.f32 %v2048_v29, %v876_v10  ;;  %v2537_v17 = vld [vmem:[#allocation30_spill] sm:$0xff] }
 0x2ac   : > { %1104 = vst [vmem:[%s2306_s20 + $0x40] sm:$0xff] %v1306_v22  ;;  %1105 = vst [vmem:[%s2306_s20 + $0x48] sm:$0xff] %v1307_v25  ;;  %v858_v56 = vmul.f32 0.6931472, %v1540_v7  ;;  %1545 = vlog2.f32 %v829_v48  ;;  %v2536_v48 = vld [vmem:[#allocation29_spill] sm:$0xff] }
 0x2ad   : > { %v1308_v46 = vpack.c.bf16 %v905_v13, %v904_v39  ;;  %v1309_v63 = vpack.c.bf16 %v907_v34, %v906_v33  ;;  %v2539_v33 = vld [vmem:[#allocation34_spill] sm:$0xff] }
 0x2ae   : > { %v1542_v40 = vpop.eup %1541  ;;  %v877_v49 = vadd.f32 %v858_v56, %v2225_v4  ;;  %v834_v12 = vpop.xlane.xlu1 %833 }
 0x2af   : > { %1106 = vst [vmem:[%s2306_s20 + $0x50] sm:$0xff] %v1308_v46  ;;  %1107 = vst [vmem:[%s2306_s20 + $0x58] sm:$0xff] %v1309_v63  ;;  %v860_v43 = vmul.f32 0.6931472, %v1542_v40  ;;  %1547 = vlog2.f32 %v834_v12 }
 0x2b0   : > { %v908_v19 = vsub.f32 %v2053_v38, %v877_v49  ;;  %v909_v29 = vsub.f32 %v2059_v45, %v877_v49  ;;  %v910_v9 = vsub.f32 %v2056_v44, %v877_v49  ;;  %v911_v53 = vsub.f32 %v2071_v59, %v877_v49  ;;  %v2541_v49 = vld [vmem:[#allocation33_spill] sm:$0xff] }
 0x2b1   : > { %v878_v57 = vadd.f32 %v860_v43, %v2235_v23  ;;  %v2542_v43 = vld [vmem:[#allocation35_spill] sm:$0xff] }
 0x2b2   : > { %v1310_v0 = vpack.c.bf16 %v909_v29, %v908_v19  ;;  %v1311_v20 = vpack.c.bf16 %v911_v53, %v910_v9  ;;  %v839_v4 = vpop.xlane.xlu0 %838 }
 0x2b3   : > { %v1544_v58 = vpop.eup %1543  ;;  %v912_v55 = vsub.f32 %v2063_v50, %v878_v57  ;;  %v913_v11 = vsub.f32 %v2534_v24, %v878_v57  ;;  %v914_v38 = vsub.f32 %v2535_v28, %v878_v57  ;;  %v915_v45 = vsub.f32 %v2080_v2, %v878_v57 }
 0x2b4   : > { %1108 = vst [vmem:[%s2306_s20 + $0x60] sm:$0xff] %v1310_v0  ;;  %1109 = vst [vmem:[%s2306_s20 + $0x68] sm:$0xff] %v1311_v20  ;;  %v862_v44 = vmul.f32 0.6931472, %v1544_v58  ;;  %1549 = vlog2.f32 %v839_v4  ;;  %v2543_v4 = vld [vmem:[#allocation36_spill] sm:$0xff] }
 0x2b5   : > { %v1312_v59 = vpack.c.bf16 %v913_v11, %v912_v55  ;;  %v1313_v23 = vpack.c.bf16 %v915_v45, %v914_v38 }
 0x2b6   : > { %v1546_v32 = vpop.eup %1545  ;;  %v879_v31 = vadd.f32 %v862_v44, %v2245_v15  ;;  %v844_v41 = vpop.xlane.xlu1 %843 }
 0x2b7   : > { %1110 = vst [vmem:[%s2306_s20 + $0x70] sm:$0xff] %v1312_v59  ;;  %1111 = vst [vmem:[%s2306_s20 + $0x78] sm:$0xff] %v1313_v23  ;;  %v864_v50 = vmul.f32 0.6931472, %v1546_v32  ;;  %1551 = vlog2.f32 %v844_v41 }
 0x2b8   : > { %v916_v27 = vsub.f32 %v2085_v8, %v879_v31  ;;  %v917_v2 = vsub.f32 %v2091_v16, %v879_v31  ;;  %v918_v36 = vsub.f32 %v2088_v14, %v879_v31  ;;  %v919_v21 = vsub.f32 %v2103_v37, %v879_v31 }
 0x2b9   : > { %v1548_v42 = vpop.eup %1547  ;;  %v880_v52 = vadd.f32 %v864_v50, %v2255_v1 }
 0x2ba   : > { %v1314_v10 = vpack.c.bf16 %v917_v2, %v916_v27  ;;  %v1315_v15 = vpack.c.bf16 %v919_v21, %v918_v36  ;;  %v866_v22 = vmul.f32 0.6931472, %v1548_v42 }
 0x2bb   : > { %v920_v25 = vsub.f32 %v2095_v26, %v880_v52  ;;  %v921_v7 = vsub.f32 %v2536_v48, %v880_v52  ;;  %v922_v8 = vsub.f32 %v2537_v17, %v880_v52  ;;  %v923_v16 = vsub.f32 %v2112_v47, %v880_v52  ;;  %v2538_v26 = vld [vmem:[#allocation31_spill] sm:$0xff] }
 0x2bc   : > { %1112 = vst [vmem:[%s2306_s20 + $0x80] sm:$0xff] %v1314_v10  ;;  %1113 = vst [vmem:[%s2306_s20 + $0x88] sm:$0xff] %v1315_v15  ;;  %v881_v14 = vadd.f32 %v866_v22, %v2265_v35 }
 0x2bd   : > { %v1316_v37 = vpack.c.bf16 %v921_v7, %v920_v25  ;;  %v1317_v1 = vpack.c.bf16 %v923_v16, %v922_v8 }
 0x2be   : > { %v1550_v39 = vpop.eup %1549  ;;  %v924_v61 = vsub.f32 %v2117_v62, %v881_v14  ;;  %v925_v13 = vsub.f32 %v2123_v5, %v881_v14  ;;  %v926_v54 = vsub.f32 %v2538_v26, %v881_v14  ;;  %v927_v34 = vsub.f32 %v2539_v33, %v881_v14  ;;  %v2540_v5 = vld [vmem:[#allocation32_spill] sm:$0xff] }
 0x2bf   : > { %1114 = vst [vmem:[%s2306_s20 + $0x90] sm:$0xff] %v1316_v37  ;;  %1115 = vst [vmem:[%s2306_s20 + $0x98] sm:$0xff] %v1317_v1  ;;  %v868_v47 = vmul.f32 0.6931472, %v1550_v39 }
 0x2c0   : > { %v1318_v56 = vpack.c.bf16 %v925_v13, %v924_v61  ;;  %v1319_v46 = vpack.c.bf16 %v927_v34, %v926_v54 }
 0x2c1   : > { %v1552_v35 = vpop.eup %1551  ;;  %v882_v63 = vadd.f32 %v868_v47, %v2275_v6 }
 0x2c2   : > { %1116 = vst [vmem:[%s2306_s20 + $0xa0] sm:$0xff] %v1318_v56  ;;  %1117 = vst [vmem:[%s2306_s20 + $0xa8] sm:$0xff] %v1319_v46  ;;  %v870_v62 = vmul.f32 0.6931472, %v1552_v35 }
 0x2c3   : > { %v928_v40 = vsub.f32 %v2540_v5, %v882_v63  ;;  %v929_v12 = vsub.f32 %v2541_v49, %v882_v63  ;;  %v930_v19 = vsub.f32 %v2542_v43, %v882_v63  ;;  %v931_v29 = vsub.f32 %v2144_v51, %v882_v63 }
 0x2c4   : > { %v883_v9 = vadd.f32 %v870_v62, %v2285_v60 }
 0x2c5   : > { %v1320_v6 = vpack.c.bf16 %v929_v12, %v928_v40  ;;  %v1321_v53 = vpack.c.bf16 %v931_v29, %v930_v19 }
 0x2c6   : > { %v932_v57 = vsub.f32 %v2149_v3, %v883_v9  ;;  %v933_v0 = vsub.f32 %v2155_v30, %v883_v9  ;;  %v934_v20 = vsub.f32 %v2152_v18, %v883_v9  ;;  %v935_v58 = vsub.f32 %v2543_v4, %v883_v9 }
 0x2c7   : > { %1118 = vst [vmem:[%s2306_s20 + $0xb0] sm:$0xff] %v1320_v6  ;;  %1119 = vst [vmem:[%s2306_s20 + $0xb8] sm:$0xff] %v1321_v53 }
 0x2c8   : > { %v1322_v51 = vpack.c.bf16 %v933_v0, %v932_v57  ;;  %v1323_v60 = vpack.c.bf16 %v935_v58, %v934_v20 }
 0x2ca   : > { %1120 = vst [vmem:[%s2306_s20 + $0xc0] sm:$0xff] %v1322_v51  ;;  %1121 = vst [vmem:[%s2306_s20 + $0xc8] sm:$0xff] %v1323_v60 }
 0x2cb   : > { %1652 = shalt.err (!%p1649_p2)
}
 0x2cc   : > { %s1653_s11 = scalar_lea.hbm %s2392_s27, 3328  ;;  %s1657_s22 = scalar_lea.hbm %s2443_s3, 6656 }
 0x2cd   : > { %p1654_p13 = scmp.ne.s32.totalorder %s2392_s27, %s1653_s11  ;;  %p1658_p4 = scmp.lt.u32.totalorder %s2392_s27, %s2443_s3 }
 0x2ce   : > { %p1659_p5 = scmp.lt.u32.totalorder %s1657_s22, %s1653_s11  ;;  %p1661_p11 = scmp.lt.u32.totalorder %s1653_s11, %s2392_s27 }
 0x2cf   : > { %p1655_p6 = pnand %p1654_p13, %p2544_p0 }
 0x2d0   : > { %p1660_p8 = por %p1659_p5, %p1658_p4 }
 0x2d1   : > { %p1656_p10 = pneg %p1655_p6 }
 0x2d2   : > { %p1662_p1 = por %p1661_p11, %p1660_p8 }
 0x2d4   : > { %p1663_p3 = pnand %p1662_p1, %p1656_p10 }
 0x2d6   : > { %1666 = shalt.err (!%p1663_p3)
}
 0x2d7   : > { %s1720_s18 = smov 256   ;;  %s1721_s20 = smov 16  }
 0x2d8   : > { %1340 = dma.vmem_to_hbm [thread:$0]  (%p2544_p0), %s2394_s21, 3328, %s2392_s27, %s1123_s23, %s1720_s18, %s1720_s18, %s1721_s20  }
 0x2d9 PF: > { %s1152_s10 = sand.u32 1, %s1697_s12   ;;  %p2545_p7 = scmp.ne.s32.totalorder %s2478_s19, 0 }
 0x2da   : > { %p2546_p9 = scmp.ge.s32.totalorder %s1709_s15, 2  ;;  %s1153_s26 = scalar_lea.sflag [#allocation4], %s1152_s10 }
 0x2dc   : > { %p1354_p12 = pnand %p2546_p9, %p2545_p7 }
 0x2de   : > { %1692 = dma.done.wait (!%p1354_p12), %s1153_s26, 3328  }
 0x2df   : > { %1694 = vsyncadd (!%p1354_p12), %s1153_s26, 4294963968  ;;  %p17_p2 = scmp.ge.s32.totalorder %s1852_s4, 4   ;;  %s2547_s12 = smov %s1701_s13 }
 0x2e0   : > { %s2548_s13 = smov %s1705_s14  ;;  %s2549_s14 = smov %s1868_s7 }
 0x2e1   : > { %s2550_s15 = smov %s1852_s4  ;;  %19 = sbr.rel (!%p17_p2) target bundleno = 6 (0x6), region = 85 }
 0x2e8   :  { %1158 = vsyncpa [#allocation3], 1 }
 0x2e9   :  { %1160 = vsyncpa [#allocation3 + $0x1], 1 }
 0x2ea   :  { %1161 = vsyncpa [#allocation6], 1 }
 0x2eb   :  { %1162 = vsyncpa [#allocation4], 1 }
 0x2ec   :  { %1164 = vsyncpa [#allocation4 + $0x1], 1 }

// kernel: _decoder_impl.1
= control target key start
LH: loop header
LB: loop body
LE: loop exit
PB: predicated region body
PF: predicated region fallthrough
CT: control target
= control target key end

     0   :  { %8 = vsyncpa [#allocation3], 0  ;;  %s2440_s0 = inlined_call_operand.hbm [shape: bf16[208,32], index: 0, kind: input, shape index: {}]   ;;  %s2441_s1 = inlined_call_operand.hbm [shape: bf16[32,512], index: 1, kind: input, shape index: {}]   ;;  %s2442_s2 = inlined_call_operand.hbm [shape: f32[1,512], index: 2, kind: input, shape index: {}]   ;;  %s2443_s3 = inlined_call_operand.hbm [shape: bf16[208,512], index: 3, kind: output, shape index: {}]  }
   0x1   :  { %10 = vsyncpa [#allocation3 + $0x1], 0 }
   0x2   :  { %11 = vsyncpa [#allocation6], 0 }
   0x3   :  { %12 = vsyncpa [#allocation4], 0 }
   0x4   :  { %14 = vsyncpa [#allocation4 + $0x1], 0  ;;  %s1742_s12 = smov 0   ;;  %s1744_s13 = smov 0  }
   0x5   :  { %s1746_s14 = smov 0   ;;  %s1748_s15 = smov 0  }
   0x6 LB: > { %s1763_s16 = sadd.s32 4294967295, %s1709_s15   ;;  %s1229_s17 = sadd.s32 4294967294, %s1709_s15   ;;  %s1709_s15 = sphi %s1748_s15, %s2550_s15   ;;  %s1705_s14 = sphi %s1746_s14, %s2549_s14   ;;  %s1701_s13 = sphi %s1744_s13, %s2548_s13   ;;  %s1697_s12 = sphi %s1742_s12, %s2547_s12  }
   0x7   : > { %p40_p0 = scmp.ne.s32.totalorder %s1701_s13, %s1697_s12  ;;  %p2444_p1 = scmp.eq.s32.totalorder %s1763_s16, 0 }
   0x8   : > { %p112_p3 = scmp.eq.s32.totalorder %s1229_s17, 1  ;;  %p1230_p5 = scmp.ge.s32.totalorder %s1709_s15, 1 }
   0x9   : > { %p1772_p4 = por %p2444_p1, %p40_p0  ;;  %p119_p7 = scmp.lt.s32.totalorder %s1709_s15, 3 }
   0xa   : > { %p1777_p6 = por %p112_p3, %p40_p0  ;;  %s1711_s21 = smov [#allocation5]  }
   0xb   : > { %s2477_s18 = scalar_select %p1772_p4, 1, 0 }
   0xc   : > { %s2478_s19 = scalar_select %p1777_p6, 1, 0 }
   0xd   : > { %p1782_p8 = pnand %p1230_p5, %p119_p7  ;;  %s131_s22 = sshll.u32 %s1711_s21, 4  ;;  %s1786_s22 = int_to_ptr.vmem [resolvable:$true] %s131_s22 }
   0xe   : > { %s1712_s24 = smov [#allocation7]   ;;  %s1553_s28 = scalar_lea.hbm %s2441_s1, 1024 }
   0xf   : > { %p1342_p9 = pneg %p1782_p8  ;;  %s145_s25 = sshll.u32 %s1712_s24, 4  ;;  %s1797_s25 = int_to_ptr.vmem [resolvable:$true] %s145_s25 }
  0x10   : > { %p1554_p12 = scmp.ne.s32.totalorder %s2441_s1, %s1553_s28  ;;  %p1560_p5 = scmp.lt.u32.totalorder %s1553_s28, %s2441_s1 }
  0x11   : > { %p1793_p11 = pnand %p1342_p9, %p2444_p1 }
  0x13   : > { %p1555_p13 = pneg %p1793_p11 }
  0x15   : > { %p1556_p0 = pnand %p1555_p13, %p1554_p12 }
  0x17   : > { %p1557_p3 = pneg %p1556_p0 }
  0x19   : > { %p1562_p7 = pnand %p1560_p5, %p1557_p3 }
  0x1b   : > { %1565 = shalt.err (!%p1562_p7)
}
  0x1c   : > { %s1566_s6 = scalar_lea.vmem %s1786_s22, 1024  ;;  %p1574_p2 = scmp.lt.s32.totalorder %s1786_s22, %s1786_s22 }
  0x1d   : > { %p1567_p9 = scmp.ne.s32.totalorder %s1786_s22, %s1566_s6  ;;  %p1575_p12 = scmp.lt.s32.totalorder %s1566_s6, %s1566_s6 }
  0x1f   : > { %p1569_p10 = pnand %p1567_p9, %p1555_p13  ;;  %p1576_p0 = por %p1575_p12, %p1574_p2 }
  0x21   : > { %p1570_p1 = pneg %p1569_p10 }
  0x23   : > { %p1577_p6 = pnand %p1576_p0, %p1570_p1 }
  0x25   : > { %1580 = shalt.err (!%p1577_p6)
}
  0x26   : > { %s1713_s7 = smov 256   ;;  %s1714_s8 = smov 16  }
  0x27   : > { %1345 = dma.hbm_to_vmem [thread:$0]  (!%p1793_p11), %s2441_s1, 1024, %s1786_s22, [#allocation6], %s1713_s7, %s1713_s7, %s1714_s8  }
  0x28   : > { %s1581_s21 = scalar_lea.hbm %s2442_s2, 64 }
  0x29   : > { %p1582_p2 = scmp.ne.s32.totalorder %s2442_s2, %s1581_s21  ;;  %p1588_p10 = scmp.lt.u32.totalorder %s1581_s21, %s2442_s2 }
  0x2b   : > { %p1584_p1 = pnand %p1582_p2, %p1555_p13 }
  0x2d   : > { %p1585_p6 = pneg %p1584_p1 }
  0x2f   : > { %p1590_p3 = pnand %p1588_p10, %p1585_p6 }
  0x31   : > { %1593 = shalt.err (!%p1590_p3)
}
  0x32   : > { %s1594_s22 = scalar_lea.vmem %s1797_s25, 64  ;;  %p1602_p12 = scmp.lt.s32.totalorder %s1797_s25, %s1797_s25 }
  0x33   : > { %p1595_p5 = scmp.ne.s32.totalorder %s1797_s25, %s1594_s22  ;;  %p1603_p0 = scmp.lt.s32.totalorder %s1594_s22, %s1594_s22 }
  0x35   : > { %p1597_p7 = pnand %p1595_p5, %p1555_p13  ;;  %p1604_p2 = por %p1603_p0, %p1602_p12 }
  0x37   : > { %p1598_p9 = pneg %p1597_p7 }
  0x39   : > { %p1605_p1 = pnand %p1604_p2, %p1598_p9 }
  0x3b   : > { %1608 = shalt.err (!%p1605_p1)
}
  0x3c   : > { %1348 = dma.hbm_to_vmem [thread:$0]  (!%p1793_p11), %s2442_s2, 64, %s1797_s25, [#allocation6]  }
  0x3d   : > { %s1852_s4 = sadd.s32 1, %s1709_s15   ;;  %s27_s23 = sadd.s32 1, %s1705_s14 }
  0x3e   : > { %s24_s5 = ssub.s32 %s1709_s15, %s1852_s4  ;;  %p34_p13 = scmp.ne.s32.totalorder %s1705_s14, %s1701_s13 }
  0x3f   : > { %p25_p6 = scmp.eq.s32.totalorder %s24_s5, 0  ;;  %p35_p10 = scmp.eq.s32.totalorder %s1709_s15, 0 }
  0x40   : > { %p2481_p3 = scmp.eq.s32.totalorder %s1763_s16, 1  ;;  %p1359_p7 = scmp.lt.s32.totalorder %s1709_s15, 2 }
  0x41   : > { %s1868_s7 = scalar_select %p25_p6, %s1705_s14, %s27_s23  }
  0x42   : > { %p1862_p5 = por %p2481_p3, %p34_p13  ;;  %p36_p9 = por %p35_p10, %p34_p13 }
  0x43   : > { %s156_s8 = sand.u32 1, %s1705_s14   ;;  %s1297_s25 = smul.u32 832, %s1709_s15 }
  0x44   : > { %s2482_s6 = scalar_select %p1862_p5, 1, 0 }
  0x45   : > { %s1327_s9 = smul.u32 52, %s156_s8  ;;  %p1872_p11 = pnand %p1359_p7, %p36_p9 }
  0x46   : > { %s1879_s21 = scalar_lea.hbm %s2440_s0, %s1297_s25  ;;  %s1883_s27 = scalar_lea.sflag [#allocation3], %s156_s8 }
  0x47   : > { %s160_s24 = scalar_lea.vmem [#allocation2], %s1327_s9  ;;  %s1609_s28 = scalar_lea.hbm %s1879_s21, 832 }
  0x48   : > { %s167_s26 = sshll.u32 %s160_s24, 4  ;;  %p1610_p12 = scmp.ne.s32.totalorder %s1879_s21, %s1609_s28  ;;  %s1881_s26 = int_to_ptr.vmem [resolvable:$true] %s167_s26 }
  0x49   : > { %p1611_p0 = pneg %p1872_p11  ;;  %s1614_s30 = scalar_lea.hbm %s2440_s0, 1664 }
  0x4a   : > { %p1615_p13 = scmp.lt.u32.totalorder %s1879_s21, %s2440_s0  ;;  %p1616_p6 = scmp.lt.u32.totalorder %s1614_s30, %s1609_s28 }
  0x4b   : > { %p1612_p2 = pnand %p1611_p0, %p1610_p12  ;;  %p1618_p3 = scmp.lt.u32.totalorder %s1609_s28, %s1879_s21 }
  0x4c   : > { %p1617_p10 = por %p1616_p6, %p1615_p13 }
  0x4d   : > { %p1613_p1 = pneg %p1612_p2 }
  0x4e   : > { %p1619_p7 = por %p1618_p3, %p1617_p10 }
  0x50   : > { %p1620_p9 = pnand %p1619_p7, %p1613_p1 }
  0x52   : > { %1623 = shalt.err (!%p1620_p9)
}
  0x53   : > { %s1624_s8 = scalar_lea.vmem %s1881_s26, 832  ;;  %s1715_s9 = smov [#allocation2]  }
  0x54   : > { %p1625_p12 = scmp.ne.s32.totalorder %s1881_s26, %s1624_s8  ;;  %s1629_s25 = sshll.u32 %s1715_s9, 4  ;;  %s1630_s25 = int_to_ptr.vmem [resolvable:$false] %s1629_s25 }
  0x55   : > { %s1631_s11 = scalar_lea.vmem %s1630_s25, 1664  ;;  %p1632_p4 = scmp.lt.s32.totalorder %s1881_s26, %s1630_s25 }
  0x56   : > { %p1627_p2 = pnand %p1625_p12, %p1611_p0  ;;  %p1633_p13 = scmp.lt.s32.totalorder %s1631_s11, %s1624_s8 }
  0x58   : > { %p1628_p5 = pneg %p1627_p2  ;;  %p1634_p6 = por %p1633_p13, %p1632_p4 }
  0x5a   : > { %p1635_p10 = pnand %p1634_p6, %p1628_p5 }
  0x5c   : > { %1638 = shalt.err (!%p1635_p10)
}
  0x5d   : > { %s1716_s17 = smov 64   ;;  %s1717_s24 = smov 4  }
  0x5e   : > { %1352 = dma.hbm_to_vmem [thread:$0]  (!%p1872_p11), %s1879_s21, 832, %s1881_s26, %s1883_s27, %s1716_s17, %s1716_s17, %s1717_s24  }
  0x5f   : > { %179 = sbr.rel (%p1782_p8) target bundleno = 729 (0x2d9), region = 32 }
  0x66   : > { %s1914_s28 = sand.u32 1, %s1701_s13   ;;  %p2484_p4 = scmp.ne.s32.totalorder %s2477_s18, 0 }
  0x67   : > { %s1328_s22 = smul.u32 52, %s1914_s28  ;;  %s182_s29 = scalar_lea.sflag [#allocation3], %s1914_s28 }
  0x69   : > { %s1918_s30 = scalar_lea.vmem [#allocation2], %s1328_s22 }
  0x6a   : > { %1684 = dma.done.wait (%p2484_p4), %s182_s29, 832  }
  0x6b   : > { %1686 = vsyncadd (%p2484_p4), %s182_s29, 4294966464  ;;  %p2485_p5 = scmp.eq.s32.totalorder %s1763_s16, 0 }
  0x6d   : > { %1688 = dma.done.wait (%p2485_p5), [#allocation6], 1088   ;;  %p2486_p8 = pmov %p2485_p5 }
  0x6e   : > { %v1718_v0 = vmov 0   ;;  %v1404_v1 = vld [vmem:[#allocation5 + $0x4] ss:$16 sps:$4 sm:$0xff]   ;;  %v1406_v2 = vld [vmem:[#allocation5 + $0xc] ss:$16 sps:$4 sm:$0xff]   ;;  %vm335_vm0 = vcmask 261120   ;;  %v242_v16 = vlaneseq }
  0x6f   : > { %1690 = vsyncadd (%p2486_p8), [#allocation6], 4294966208  ;;  %389 = vmatprep.mubr.bf16.mxu0 %v1718_v0  ;;  %490 = vmatprep.mubr.bf16.mxu1 %v1718_v0  ;;  %v1408_v3 = vld [vmem:[#allocation5] ss:$16 sps:$4 sm:$0xff]   ;;  %v1409_v4 = vld [vmem:[#allocation5 + $0x8] ss:$16 sps:$4 sm:$0xff]  }
  0x70   : > { %357 = vmatprep.subr.bf16.mxu0 %v1404_v1  ;;  %458 = vmatprep.subr.bf16.mxu1 %v1406_v2  ;;  %v1410_v5 = vld [vmem:[#allocation5 + $0x24] ss:$16 sps:$4 sm:$0xff]   ;;  %v1412_v6 = vld [vmem:[#allocation5 + $0x2c] ss:$16 sps:$4 sm:$0xff]   ;;  %v1414_v7 = vld [vmem:[#allocation5 + $0x20] ss:$16 sps:$4 sm:$0xff]  }
  0x71   : > { %358 = vmatpush1.bf16.msra.mxu0 %v1408_v3  ;;  %459 = vmatpush1.bf16.msra.mxu1 %v1409_v4  ;;  %v1415_v8 = vld [vmem:[#allocation5 + $0x28] ss:$16 sps:$4 sm:$0xff]   ;;  %v243_v17 = vshrl.u32 %v242_v16, 7  ;;  %v240_v19 = vld [vmem:[#allocation7] sm:$0xf]  ;;  %s1329_s18 = smul.u32 208, %s1914_s28 }
  0x72   : > { %359 = vmatprep.subr.bf16.mxu0 %v1410_v5  ;;  %460 = vmatprep.subr.bf16.mxu1 %v1412_v6  ;;  %v1416_v9 = vld [vmem:[%s1918_s30] sm:$0xff]   ;;  %v1417_v10 = vld [vmem:[%s1918_s30 + $0x8] sm:$0xff]   ;;  %v1418_v11 = vld [vmem:[%s1918_s30 + $0x10] sm:$0xff]   ;;  %s1326_s10 = smul.u32 3328, %s1763_s16  ;;  %s1123_s23 = scalar_lea.sflag [#allocation4], %s1914_s28 }
  0x73   : > { %v1419_v12 = vld [vmem:[%s1918_s30 + $0x18] sm:$0xff]   ;;  %v1420_v13 = vld [vmem:[%s1918_s30 + $0x20] sm:$0xff]   ;;  %v1421_v14 = vld [vmem:[%s1918_s30 + $0x28] sm:$0xff]   ;;  %v244_v18 = vsub.s32 0, %v243_v17  ;;  %v252_v20 = vsub.s32 2, %v243_v17  ;;  %v248_v21 = vsub.s32 1, %v243_v17 }
  0x74   : > { %v1422_v15 = vld [vmem:[%s1918_s30 + $0x30] ss:$0 sps:$4 sm:$0xff]   ;;  %v256_v25 = vsub.s32 3, %v243_v17  ;;  %s2306_s20 = scalar_lea.vmem [#allocation8], %s1329_s18  ;;  %s2392_s27 = scalar_lea.hbm %s2443_s3, %s1326_s10 }
  0x75   : > { %360 = vmatpush1.bf16.msra.mxu0 %v1414_v7  ;;  %461 = vmatpush1.bf16.msra.mxu1 %v1415_v8  ;;  %v1949_v22 = vrot.slane %v240_v19, %v244_v18  ;;  %v1951_v23 = vrot.slane %v240_v19, %v252_v20  ;;  %v1953_v24 = vrot.slane %v240_v19, %v248_v21  ;;  %s1137_s21 = sshll.u32 %s2306_s20, 4  ;;  %p2544_p0 = scmp.ne.s32.totalorder %s2482_s6, 0  ;;  %s2394_s21 = int_to_ptr.vmem [resolvable:$true] %s1137_s21 }
  0x76   : > { %v1964_v33 = vrot.slane %v240_v19, %v256_v25  ;;  %s1639_s5 = scalar_lea.vmem %s2394_s21, 3328  ;;  %s1719_s8 = smov [#allocation8]  }
  0x77   : > { %p1640_p11 = scmp.ne.s32.totalorder %s2394_s21, %s1639_s5  ;;  %s1643_s9 = sshll.u32 %s1719_s8, 4  ;;  %s1644_s9 = int_to_ptr.vmem [resolvable:$false] %s1643_s9 }
  0x78   : > { %1253 = vmatmul.mubr.msk.bf16.vlgmr.msra.gmra.mrb[0].mxu0 %vm335_vm0, %v1416_v9  ;;  %1260 = vmatmul.mubr.msk.bf16.vlgmr.msra.gmra.mrb[0].mxu1 %vm335_vm0, %v1416_v9  ;;  %s1645_s25 = scalar_lea.vmem %s1644_s9, 6656  ;;  %p1646_p7 = scmp.lt.s32.totalorder %s2394_s21, %s1644_s9 }
  0x79   : > { %399 = vmatprep.mubr.bf16.mxu0 %v1718_v0  ;;  %500 = vmatprep.mubr.bf16.mxu1 %v1718_v0  ;;  %p1641_p1 = pnand %p1640_p11, %p2544_p0  ;;  %p1647_p9 = scmp.lt.s32.totalorder %s1645_s25, %s1639_s5 }
  0x7b   : > { %p1642_p3 = pneg %p1641_p1  ;;  %p1648_p12 = por %p1647_p9, %p1646_p7 }
  0x7d   : > { %p1649_p2 = pnand %p1648_p12, %p1642_p3 }
  0x80   : > { %1254 = vmatmul.mubr.msk.bf16.gmra.mrb[4].mxu0 %vm335_vm0, %v1417_v10  ;;  %1261 = vmatmul.mubr.msk.bf16.gmra.mrb[4].mxu1 %vm335_vm0, %v1417_v10 }
  0x81   : > { %409 = vmatprep.mubr.bf16.mxu0 %v1718_v0  ;;  %510 = vmatprep.mubr.bf16.mxu1 %v1718_v0 }
  0x88   : > { %1255 = vmatmul.mubr.msk.bf16.gmra.mrb[8].mxu0 %vm335_vm0, %v1418_v11  ;;  %1262 = vmatmul.mubr.msk.bf16.gmra.mrb[8].mxu1 %vm335_vm0, %v1418_v11 }
  0x89   : > { %419 = vmatprep.mubr.bf16.mxu0 %v1718_v0  ;;  %520 = vmatprep.mubr.bf16.mxu1 %v1718_v0 }
  0x90   : > { %1256 = vmatmul.mubr.msk.bf16.gmra.mrb[12].mxu0 %vm335_vm0, %v1419_v12  ;;  %1263 = vmatmul.mubr.msk.bf16.gmra.mrb[12].mxu1 %vm335_vm0, %v1419_v12 }
  0x91   : > { %429 = vmatprep.mubr.bf16.mxu0 %v1718_v0  ;;  %530 = vmatprep.mubr.bf16.mxu1 %v1718_v0 }
  0x98   : > { %1257 = vmatmul.mubr.msk.bf16.gmra.mrb[16].mxu0 %vm335_vm0, %v1420_v13  ;;  %1264 = vmatmul.mubr.msk.bf16.gmra.mrb[16].mxu1 %vm335_vm0, %v1420_v13 }
  0x99   : > { %439 = vmatprep.mubr.bf16.mxu0 %v1718_v0  ;;  %540 = vmatprep.mubr.bf16.mxu1 %v1718_v0 }
  0xa0   : > { %1258 = vmatmul.mubr.msk.bf16.gmra.mrb[20].mxu0 %vm335_vm0, %v1421_v14  ;;  %1265 = vmatmul.mubr.msk.bf16.gmra.mrb[20].mxu1 %vm335_vm0, %v1421_v14 }
  0xa1   : > { %449 = vmatprep.mubr.bf16.mxu0 %v1718_v0  ;;  %550 = vmatprep.mubr.bf16.mxu1 %v1718_v0 }
  0xa8   : > { %1259 = vmatmul.mubr.msk.bf16.gmra.mrb[24].mxu0 %vm335_vm0, %v1422_v15  ;;  %1266 = vmatmul.mubr.msk.bf16.gmra.mrb[24].mxu1 %vm335_vm0, %v1422_v15 }
 0x14b   : > { %v391_v26 = vpop.f32.mrb[0].mxu0  ;;  %v492_v27 = vpop.f32.mrb[0].mxu1 }
 0x14c   : > { %v1956_v28 = vadd.f32 %v391_v26, %v1949_v22  ;;  %v393_v29 = vpop.f32.mrb[1].mxu0  ;;  %v494_v30 = vpop.f32.mrb[1].mxu1  ;;  %v1959_v31 = vadd.f32 %v492_v27, %v1951_v23 }
 0x14d   : > { %v1962_v32 = vadd.f32 %v393_v29, %v1953_v24  ;;  %v395_v34 = vpop.f32.mrb[2].mxu0  ;;  %v496_v35 = vpop.f32.mrb[2].mxu1  ;;  %v1975_v41 = vadd.f32 %v494_v30, %v1964_v33 }
 0x14e   : > { %v1967_v36 = vadd.f32 %v395_v34, %v1949_v22  ;;  %v397_v37 = vpop.f32.mrb[3].mxu0  ;;  %v498_v38 = vpop.f32.mrb[3].mxu1  ;;  %v1978_v42 = vadd.f32 %v496_v35, %v1951_v23 }
 0x14f   : > { %v1970_v39 = vadd.f32 %v397_v37, %v1953_v24  ;;  %v559_v40 = vmax.f32 %v1956_v28, %v1962_v32  ;;  %v1989_v52 = vadd.f32 %v498_v38, %v1964_v33 }
 0x151   : > { %2487 = vst [vmem:[#allocation12_spill] sm:$0xff] %v1970_v39  ;;  %v564_v43 = vmax.f32 %v1967_v36, %v1970_v39  ;;  %v560_v44 = vmax.f32 %v559_v40, %v1959_v31 }
 0x153   : > { %v401_v45 = vpop.f32.mrb[4].mxu0  ;;  %v502_v46 = vpop.f32.mrb[4].mxu1  ;;  %v561_v47 = vmax.f32 %v560_v44, %v1975_v41  ;;  %v565_v48 = vmax.f32 %v564_v43, %v1978_v42 }
 0x154   : > { %v1986_v49 = vadd.f32 %v401_v45, %v1949_v22  ;;  %v403_v50 = vpop.f32.mrb[5].mxu0  ;;  %v504_v51 = vpop.f32.mrb[5].mxu1  ;;  %v1992_v53 = vadd.f32 %v502_v46, %v1951_v23 }
 0x155   : > { %v1995_v54 = vadd.f32 %v403_v50, %v1953_v24  ;;  %v405_v55 = vpop.f32.mrb[6].mxu0  ;;  %v506_v56 = vpop.f32.mrb[6].mxu1  ;;  %562 = vmax.xlane.f32.xlu0 %v561_v47  ;;  %v566_v61 = vmax.f32 %v565_v48, %v1989_v52  ;;  %v2007_v63 = vadd.f32 %v504_v51, %v1964_v33 }
 0x156   : > { %2488 = vst [vmem:[#allocation13_spill] sm:$0xff] %v1992_v53  ;;  %v1998_v57 = vadd.f32 %v405_v55, %v1949_v22  ;;  %v407_v58 = vpop.f32.mrb[7].mxu0  ;;  %v508_v59 = vpop.f32.mrb[7].mxu1  ;;  %v2010_v0 = vadd.f32 %v506_v56, %v1951_v23 }
 0x157   : > { %2489 = vst [vmem:[#allocation14_spill] sm:$0xff] %v1995_v54  ;;  %v2001_v60 = vadd.f32 %v407_v58, %v1953_v24  ;;  %v569_v62 = vmax.f32 %v1986_v49, %v1995_v54  ;;  %2492 = vst [vmem:[#allocation17_spill] sm:$0xff] %v2007_v63  ;;  %v2021_v10 = vadd.f32 %v508_v59, %v1964_v33 }
 0x158   : > { %2490 = vst [vmem:[#allocation15_spill] sm:$0xff] %v1998_v57  ;;  %2493 = vst [vmem:[#allocation18_spill] sm:$0xff] %v2010_v0 }
 0x159   : > { %2491 = vst [vmem:[#allocation16_spill] sm:$0xff] %v2001_v60  ;;  %v574_v1 = vmax.f32 %v1998_v57, %v2001_v60  ;;  %567 = vmax.xlane.f32.xlu0 %v566_v61  ;;  %v570_v2 = vmax.f32 %v569_v62, %v1992_v53  ;;  %2495 = vst [vmem:[#allocation20_spill] sm:$0xff] %v2021_v10 }
 0x15b   : > { %v411_v3 = vpop.f32.mrb[8].mxu0  ;;  %v512_v4 = vpop.f32.mrb[8].mxu1  ;;  %v571_v5 = vmax.f32 %v570_v2, %v2007_v63  ;;  %v575_v6 = vmax.f32 %v574_v1, %v2010_v0 }
 0x15c   : > { %v2018_v7 = vadd.f32 %v411_v3, %v1949_v22  ;;  %v413_v8 = vpop.f32.mrb[9].mxu0  ;;  %v514_v9 = vpop.f32.mrb[9].mxu1  ;;  %v2024_v11 = vadd.f32 %v512_v4, %v1951_v23 }
 0x15d   : > { %v2027_v12 = vadd.f32 %v413_v8, %v1953_v24  ;;  %v415_v13 = vpop.f32.mrb[10].mxu0  ;;  %v516_v14 = vpop.f32.mrb[10].mxu1  ;;  %572 = vmax.xlane.f32.xlu1 %v571_v5  ;;  %v576_v20 = vmax.f32 %v575_v6, %v2021_v10  ;;  %v2039_v21 = vadd.f32 %v514_v9, %v1964_v33 }
 0x15e   : > { %2494 = vst [vmem:[#allocation19_spill] sm:$0xff] %v2018_v7  ;;  %2496 = vst [vmem:[#allocation21_spill] sm:$0xff] %v2024_v11  ;;  %v2030_v15 = vadd.f32 %v415_v13, %v1949_v22  ;;  %v417_v16 = vpop.f32.mrb[11].mxu0  ;;  %v518_v17 = vpop.f32.mrb[11].mxu1  ;;  %v2042_v25 = vadd.f32 %v516_v14, %v1951_v23 }
 0x15f   : > { %2497 = vst [vmem:[#allocation22_spill] sm:$0xff] %v2027_v12  ;;  %v579_v18 = vmax.f32 %v2018_v7, %v2027_v12  ;;  %v2035_v19 = vadd.f32 %v417_v16, %v1953_v24  ;;  %2500 = vst [vmem:[#allocation25_spill] sm:$0xff] %v2039_v21  ;;  %v2048_v29 = vadd.f32 %v518_v17, %v1964_v33 }
 0x160   : > { %2498 = vst [vmem:[#allocation23_spill] sm:$0xff] %v2030_v15  ;;  %2501 = vst [vmem:[#allocation26_spill] sm:$0xff] %v2042_v25 }
 0x161   : > { %2499 = vst [vmem:[#allocation24_spill] sm:$0xff] %v2035_v19  ;;  %v584_v26 = vmax.f32 %v2030_v15, %v2035_v19  ;;  %577 = vmax.xlane.f32.xlu1 %v576_v20  ;;  %v580_v27 = vmax.f32 %v579_v18, %v2024_v11 }
 0x163   : > { %v421_v30 = vpop.f32.mrb[12].mxu0  ;;  %v522_v34 = vpop.f32.mrb[12].mxu1  ;;  %v581_v35 = vmax.f32 %v580_v27, %v2039_v21  ;;  %v585_v37 = vmax.f32 %v584_v26, %v2042_v25 }
 0x164   : > { %v2053_v38 = vadd.f32 %v421_v30, %v1949_v22  ;;  %v423_v40 = vpop.f32.mrb[13].mxu0  ;;  %v524_v43 = vpop.f32.mrb[13].mxu1  ;;  %v2056_v44 = vadd.f32 %v522_v34, %v1951_v23 }
 0x165   : > { %v2059_v45 = vadd.f32 %v423_v40, %v1953_v24  ;;  %v425_v46 = vpop.f32.mrb[14].mxu0  ;;  %v526_v47 = vpop.f32.mrb[14].mxu1  ;;  %582 = vmax.xlane.f32.xlu0 %v581_v35  ;;  %v586_v48 = vmax.f32 %v585_v37, %v2048_v29  ;;  %v2071_v59 = vadd.f32 %v524_v43, %v1964_v33 }
 0x166   : > { %v2063_v50 = vadd.f32 %v425_v46, %v1949_v22  ;;  %v427_v51 = vpop.f32.mrb[15].mxu0  ;;  %v528_v55 = vpop.f32.mrb[15].mxu1  ;;  %v2074_v61 = vadd.f32 %v526_v47, %v1951_v23 }
 0x167   : > { %v589_v56 = vmax.f32 %v2053_v38, %v2059_v45  ;;  %v2068_v58 = vadd.f32 %v427_v51, %v1953_v24  ;;  %587 = vmax.xlane.f32.xlu1 %v586_v48  ;;  %v2080_v2 = vadd.f32 %v528_v55, %v1964_v33 }
 0x168   : > { %2503 = vst [vmem:[#allocation28_spill] sm:$0xff] %v2074_v61 }
 0x169   : > { %2502 = vst [vmem:[#allocation27_spill] sm:$0xff] %v2068_v58  ;;  %v594_v62 = vmax.f32 %v2063_v50, %v2068_v58  ;;  %v590_v1 = vmax.f32 %v589_v56, %v2056_v44 }
 0x16b   : > { %v431_v3 = vpop.f32.mrb[16].mxu0  ;;  %v532_v4 = vpop.f32.mrb[16].mxu1  ;;  %v591_v5 = vmax.f32 %v590_v1, %v2071_v59  ;;  %v595_v6 = vmax.f32 %v594_v62, %v2074_v61 }
 0x16c   : > { %v2085_v8 = vadd.f32 %v431_v3, %v1949_v22  ;;  %v433_v9 = vpop.f32.mrb[17].mxu0  ;;  %v534_v13 = vpop.f32.mrb[17].mxu1  ;;  %v2088_v14 = vadd.f32 %v532_v4, %v1951_v23 }
 0x16d   : > { %v2091_v16 = vadd.f32 %v433_v9, %v1953_v24  ;;  %v435_v17 = vpop.f32.mrb[18].mxu0  ;;  %v536_v18 = vpop.f32.mrb[18].mxu1  ;;  %592 = vmax.xlane.f32.xlu0 %v591_v5  ;;  %v596_v20 = vmax.f32 %v595_v6, %v2080_v2  ;;  %v2103_v37 = vadd.f32 %v534_v13, %v1964_v33 }
 0x16e   : > { %v2095_v26 = vadd.f32 %v435_v17, %v1949_v22  ;;  %v437_v27 = vpop.f32.mrb[19].mxu0  ;;  %v538_v30 = vpop.f32.mrb[19].mxu1  ;;  %v2106_v40 = vadd.f32 %v536_v18, %v1951_v23 }
 0x16f   : > { %v599_v34 = vmax.f32 %v2085_v8, %v2091_v16  ;;  %v2100_v35 = vadd.f32 %v437_v27, %v1953_v24  ;;  %597 = vmax.xlane.f32.xlu1 %v596_v20  ;;  %v2112_v47 = vadd.f32 %v538_v30, %v1964_v33 }
 0x170   : > { %2505 = vst [vmem:[#allocation30_spill] sm:$0xff] %v2106_v40 }
 0x171   : > { %2504 = vst [vmem:[#allocation29_spill] sm:$0xff] %v2100_v35  ;;  %v604_v43 = vmax.f32 %v2095_v26, %v2100_v35  ;;  %v600_v46 = vmax.f32 %v599_v34, %v2088_v14 }
 0x173   : > { %v441_v48 = vpop.f32.mrb[20].mxu0  ;;  %v542_v51 = vpop.f32.mrb[20].mxu1  ;;  %v601_v55 = vmax.f32 %v600_v46, %v2103_v37  ;;  %v605_v56 = vmax.f32 %v604_v43, %v2106_v40 }
 0x174   : > { %v2117_v62 = vadd.f32 %v441_v48, %v1949_v22  ;;  %v443_v1 = vpop.f32.mrb[21].mxu0  ;;  %v544_v3 = vpop.f32.mrb[21].mxu1  ;;  %v2120_v4 = vadd.f32 %v542_v51, %v1951_v23 }
 0x175   : > { %v2123_v5 = vadd.f32 %v443_v1, %v1953_v24  ;;  %v445_v6 = vpop.f32.mrb[22].mxu0  ;;  %v546_v9 = vpop.f32.mrb[22].mxu1  ;;  %602 = vmax.xlane.f32.xlu0 %v601_v55  ;;  %v606_v13 = vmax.f32 %v605_v56, %v2112_v47  ;;  %v2135_v34 = vadd.f32 %v544_v3, %v1964_v33 }
 0x176   : > { %2506 = vst [vmem:[#allocation31_spill] sm:$0xff] %v2120_v4  ;;  %v2127_v17 = vadd.f32 %v445_v6, %v1949_v22  ;;  %v447_v18 = vpop.f32.mrb[23].mxu0  ;;  %v548_v20 = vpop.f32.mrb[23].mxu1  ;;  %v2138_v43 = vadd.f32 %v546_v9, %v1951_v23 }
 0x177   : > { %v609_v27 = vmax.f32 %v2117_v62, %v2123_v5  ;;  %v2132_v30 = vadd.f32 %v447_v18, %v1953_v24  ;;  %607 = vmax.xlane.f32.xlu1 %v606_v13  ;;  %2509 = vst [vmem:[#allocation34_spill] sm:$0xff] %v2135_v34  ;;  %v2144_v51 = vadd.f32 %v548_v20, %v1964_v33 }
 0x178   : > { %2507 = vst [vmem:[#allocation32_spill] sm:$0xff] %v2127_v17  ;;  %2510 = vst [vmem:[#allocation35_spill] sm:$0xff] %v2138_v43 }
 0x179   : > { %2508 = vst [vmem:[#allocation33_spill] sm:$0xff] %v2132_v30  ;;  %v614_v46 = vmax.f32 %v2127_v17, %v2132_v30  ;;  %v610_v48 = vmax.f32 %v609_v27, %v2120_v4 }
 0x17b   : > { %v451_v55 = vpop.f32.mrb[24].mxu0  ;;  %v552_v56 = vpop.f32.mrb[24].mxu1  ;;  %v611_v1 = vmax.f32 %v610_v48, %v2135_v34  ;;  %v615_v6 = vmax.f32 %v614_v46, %v2138_v43 }
 0x17c   : > { %v2149_v3 = vadd.f32 %v451_v55, %v1949_v22  ;;  %v453_v13 = vpop.f32.mrb[25].mxu0  ;;  %v554_v9 = vpop.f32.mrb[25].mxu1  ;;  %v2152_v18 = vadd.f32 %v552_v56, %v1951_v23 }
 0x17d   : > { %v2155_v30 = vadd.f32 %v453_v13, %v1953_v24  ;;  %v455_v27 = vpop.f32.mrb[26].mxu0  ;;  %v556_v20 = vpop.f32.mrb[26].mxu1  ;;  %612 = vmax.xlane.f32.xlu0 %v611_v1  ;;  %v616_v17 = vmax.f32 %v615_v6, %v2144_v51  ;;  %v2161_v22 = vadd.f32 %v554_v9, %v1964_v33 }
 0x17e   : > { %v456_v4 = vpop.f32.mrb[27].mxu0  ;;  %v557_v48 = vpop.f32.mrb[27].mxu1 }
 0x17f   : > { %v619_v46 = vmax.f32 %v2149_v3, %v2155_v30  ;;  %617 = vmax.xlane.f32.xlu1 %v616_v17  ;;  %2511 = vst [vmem:[#allocation36_spill] sm:$0xff] %v2161_v22 }
 0x181   : > { %v620_v23 = vmax.f32 %v619_v46, %v2152_v18 }
 0x183   : > { %v621_v55 = vmax.f32 %v620_v23, %v2161_v22 }
 0x185   : > { %622 = vmax.xlane.f32.xlu0 %v621_v55 }
 0x1e2   : > { %v2165_v24 = vpop.xlane.xlu0 %562 }
 0x1e3   : > { %v624_v56 = vsub.f32 %v1956_v28, %v2165_v24  ;;  %v625_v4 = vsub.f32 %v1962_v32, %v2165_v24  ;;  %v626_v1 = vsub.f32 %v1959_v31, %v2165_v24  ;;  %v627_v33 = vsub.f32 %v1975_v41, %v2165_v24 }
 0x1e5   : > { %v676_v17 = vmul.f32 1.442695, %v624_v56  ;;  %v678_v6 = vmul.f32 1.442695, %v625_v4  ;;  %v680_v13 = vmul.f32 1.442695, %v626_v1 }
 0x1e6   : > { %v682_v9 = vmul.f32 1.442695, %v627_v33  ;;  %v2175_v27 = vpop.xlane.xlu0 %567 }
 0x1e7   : > { %1423 = vpow2.f32 %v676_v17  ;;  %v628_v20 = vsub.f32 %v1967_v36, %v2175_v27  ;;  %v629_v48 = vsub.f32 %v1970_v39, %v2175_v27  ;;  %v630_v46 = vsub.f32 %v1978_v42, %v2175_v27 }
 0x1e8   : > { %1425 = vpow2.f32 %v678_v6  ;;  %v631_v23 = vsub.f32 %v1989_v52, %v2175_v27 }
 0x1e9   : > { %1427 = vpow2.f32 %v680_v13  ;;  %v684_v55 = vmul.f32 1.442695, %v628_v20  ;;  %v686_v56 = vmul.f32 1.442695, %v629_v48  ;;  %v688_v4 = vmul.f32 1.442695, %v630_v46 }
 0x1ea   : > { %1429 = vpow2.f32 %v682_v9  ;;  %v690_v1 = vmul.f32 1.442695, %v631_v23  ;;  %v2185_v33 = vpop.xlane.xlu1 %572 }
 0x1eb   : > { %1431 = vpow2.f32 %v684_v55  ;;  %v632_v17 = vsub.f32 %v1986_v49, %v2185_v33  ;;  %v633_v39 = vsub.f32 %v1995_v54, %v2185_v33  ;;  %v634_v6 = vsub.f32 %v1992_v53, %v2185_v33 }
 0x1ec   : > { %1433 = vpow2.f32 %v686_v56  ;;  %v635_v13 = vsub.f32 %v2007_v63, %v2185_v33 }
 0x1ed   : > { %1435 = vpow2.f32 %v688_v4  ;;  %v692_v20 = vmul.f32 1.442695, %v632_v17  ;;  %v694_v9 = vmul.f32 1.442695, %v633_v39  ;;  %v696_v48 = vmul.f32 1.442695, %v634_v6 }
 0x1ee   : > { %1437 = vpow2.f32 %v690_v1  ;;  %v698_v46 = vmul.f32 1.442695, %v635_v13  ;;  %v2195_v23 = vpop.xlane.xlu1 %577 }
 0x1ef   : > { %2512 = vst [vmem:[#allocation37_spill] sm:$0xff] %v2195_v23  ;;  %1439 = vpow2.f32 %v692_v20  ;;  %v636_v55 = vsub.f32 %v1998_v57, %v2195_v23  ;;  %v637_v54 = vsub.f32 %v2001_v60, %v2195_v23  ;;  %v638_v56 = vsub.f32 %v2010_v0, %v2195_v23 }
 0x1f0   : > { %1441 = vpow2.f32 %v694_v9  ;;  %v639_v4 = vsub.f32 %v2021_v10, %v2195_v23 }
 0x1f1   : > { %v1424_v39 = vpop.eup %1423  ;;  %1443 = vpow2.f32 %v696_v48  ;;  %v700_v1 = vmul.f32 1.442695, %v636_v55  ;;  %v702_v17 = vmul.f32 1.442695, %v637_v54  ;;  %v704_v6 = vmul.f32 1.442695, %v638_v56 }
 0x1f2   : > { %v1426_v13 = vpop.eup %1425  ;;  %1445 = vpow2.f32 %v698_v46  ;;  %v706_v20 = vmul.f32 1.442695, %v639_v4  ;;  %v2205_v63 = vpop.xlane.xlu0 %582 }
 0x1f3   : > { %2513 = vst [vmem:[#allocation38_spill] sm:$0xff] %v2205_v63  ;;  %v1428_v57 = vpop.eup %1427  ;;  %1447 = vpow2.f32 %v700_v1  ;;  %v640_v60 = vsub.f32 %v2018_v7, %v2205_v63  ;;  %v641_v9 = vsub.f32 %v2027_v12, %v2205_v63  ;;  %v642_v10 = vsub.f32 %v2024_v11, %v2205_v63 }
 0x1f4   : > { %v1430_v48 = vpop.eup %1429  ;;  %1449 = vpow2.f32 %v702_v17  ;;  %v643_v54 = vsub.f32 %v2039_v21, %v2205_v63  ;;  %v2215_v46 = vpop.xlane.xlu1 %587  ;;  %v780_v55 = vadd.f32 %v1426_v13, %v1424_v39 }
 0x1f5   : > { %v1432_v56 = vpop.eup %1431  ;;  %1451 = vpow2.f32 %v704_v6  ;;  %v708_v4 = vmul.f32 1.442695, %v640_v60  ;;  %v710_v1 = vmul.f32 1.442695, %v641_v9  ;;  %v712_v0 = vmul.f32 1.442695, %v642_v10 }
 0x1f6   : > { %v1434_v7 = vpop.eup %1433  ;;  %1453 = vpow2.f32 %v706_v20  ;;  %v714_v23 = vmul.f32 1.442695, %v643_v54  ;;  %v644_v12 = vsub.f32 %v2030_v15, %v2215_v46  ;;  %v645_v17 = vsub.f32 %v2035_v19, %v2215_v46 }
 0x1f7   : > { %v1436_v11 = vpop.eup %1435  ;;  %1455 = vpow2.f32 %v708_v4  ;;  %v646_v21 = vsub.f32 %v2042_v25, %v2215_v46  ;;  %v647_v39 = vsub.f32 %v2048_v29, %v2215_v46  ;;  %v781_v60 = vadd.f32 %v1428_v57, %v780_v55 }
 0x1f8   : > { %v1438_v6 = vpop.eup %1437  ;;  %1457 = vpow2.f32 %v710_v1  ;;  %v716_v10 = vmul.f32 1.442695, %v644_v12  ;;  %v718_v13 = vmul.f32 1.442695, %v645_v17  ;;  %v785_v20 = vadd.f32 %v1434_v7, %v1432_v56 }
 0x1f9   : > { %v1440_v9 = vpop.eup %1439  ;;  %1459 = vpow2.f32 %v712_v0  ;;  %v720_v54 = vmul.f32 1.442695, %v646_v21  ;;  %v782_v15 = vadd.f32 %v1430_v48, %v781_v60  ;;  %v722_v19 = vmul.f32 1.442695, %v647_v39 }
 0x1fa   : > { %v1442_v63 = vpop.eup %1441  ;;  %1461 = vpow2.f32 %v714_v23  ;;  %v2225_v4 = vpop.xlane.xlu0 %592  ;;  %v786_v53 = vadd.f32 %v1436_v11, %v785_v20 }
 0x1fb   : > { %v1444_v25 = vpop.eup %1443  ;;  %1463 = vpow2.f32 %v716_v10  ;;  %783 = vadd.xlane.f32.xlu1 %v782_v15  ;;  %v648_v57 = vsub.f32 %v2053_v38, %v2225_v4  ;;  %v649_v12 = vsub.f32 %v2059_v45, %v2225_v4  ;;  %v650_v0 = vsub.f32 %v2056_v44, %v2225_v4 }
 0x1fc   : > { %v1446_v7 = vpop.eup %1445  ;;  %1465 = vpow2.f32 %v718_v13  ;;  %v651_v21 = vsub.f32 %v2071_v59, %v2225_v4  ;;  %v2235_v23 = vpop.xlane.xlu1 %597  ;;  %v787_v11 = vadd.f32 %v1438_v6, %v786_v53  ;;  %v790_v48 = vadd.f32 %v1442_v63, %v1440_v9 }
 0x1fd   : > { %v1448_v55 = vpop.eup %1447  ;;  %1467 = vpow2.f32 %v720_v54  ;;  %v724_v15 = vmul.f32 1.442695, %v648_v57  ;;  %v726_v56 = vmul.f32 1.442695, %v649_v12  ;;  %v728_v1 = vmul.f32 1.442695, %v650_v0 }
 0x1fe   : > { %v1450_v17 = vpop.eup %1449  ;;  %1469 = vpow2.f32 %v722_v19  ;;  %v730_v39 = vmul.f32 1.442695, %v651_v21  ;;  %v652_v60 = vsub.f32 %v2063_v50, %v2235_v23  ;;  %v653_v10 = vsub.f32 %v2068_v58, %v2235_v23  ;;  %788 = vadd.xlane.f32.xlu0 %v787_v11 }
 0x1ff   : > { %v1452_v13 = vpop.eup %1451  ;;  %1471 = vpow2.f32 %v724_v15  ;;  %v654_v53 = vsub.f32 %v2074_v61, %v2235_v23  ;;  %v655_v63 = vsub.f32 %v2080_v2, %v2235_v23  ;;  %v791_v6 = vadd.f32 %v1444_v25, %v790_v48 }
 0x200   : > { %v1454_v20 = vpop.eup %1453  ;;  %1473 = vpow2.f32 %v726_v56  ;;  %v732_v19 = vmul.f32 1.442695, %v652_v60  ;;  %v734_v9 = vmul.f32 1.442695, %v653_v10  ;;  %v795_v54 = vadd.f32 %v1450_v17, %v1448_v55 }
 0x201   : > { %v1456_v57 = vpop.eup %1455  ;;  %1475 = vpow2.f32 %v728_v1  ;;  %v736_v12 = vmul.f32 1.442695, %v654_v53  ;;  %v792_v0 = vadd.f32 %v1446_v7, %v791_v6  ;;  %v738_v11 = vmul.f32 1.442695, %v655_v63 }
 0x202   : > { %v1458_v21 = vpop.eup %1457  ;;  %1477 = vpow2.f32 %v730_v39  ;;  %v2245_v15 = vpop.xlane.xlu0 %602  ;;  %v796_v58 = vadd.f32 %v1452_v13, %v795_v54 }
 0x203   : > { %v1460_v61 = vpop.eup %1459  ;;  %1479 = vpow2.f32 %v732_v19  ;;  %793 = vadd.xlane.f32.xlu1 %v792_v0  ;;  %v656_v25 = vsub.f32 %v2085_v8, %v2245_v15  ;;  %v657_v48 = vsub.f32 %v2091_v16, %v2245_v15  ;;  %v658_v55 = vsub.f32 %v2088_v14, %v2245_v15 }
 0x204   : > { %v1462_v56 = vpop.eup %1461  ;;  %1481 = vpow2.f32 %v734_v9  ;;  %v659_v7 = vsub.f32 %v2103_v37, %v2245_v15  ;;  %v2255_v1 = vpop.xlane.xlu1 %607  ;;  %v797_v17 = vadd.f32 %v1454_v20, %v796_v58  ;;  %v800_v39 = vadd.f32 %v1458_v21, %v1456_v57 }
 0x205   : > { %v1464_v60 = vpop.eup %1463  ;;  %1483 = vpow2.f32 %v736_v12  ;;  %v740_v10 = vmul.f32 1.442695, %v656_v25  ;;  %v742_v13 = vmul.f32 1.442695, %v657_v48  ;;  %v744_v53 = vmul.f32 1.442695, %v658_v55 }
 0x206   : > { %v1466_v63 = vpop.eup %1465  ;;  %1485 = vpow2.f32 %v738_v11  ;;  %v746_v6 = vmul.f32 1.442695, %v659_v7  ;;  %v660_v19 = vsub.f32 %v2095_v26, %v2255_v1  ;;  %v661_v9 = vsub.f32 %v2100_v35, %v2255_v1  ;;  %798 = vadd.xlane.f32.xlu0 %v797_v17 }
 0x207   : > { %v1468_v54 = vpop.eup %1467  ;;  %1487 = vpow2.f32 %v740_v10  ;;  %v662_v58 = vsub.f32 %v2106_v40, %v2255_v1  ;;  %v663_v20 = vsub.f32 %v2112_v47, %v2255_v1  ;;  %v801_v57 = vadd.f32 %v1460_v61, %v800_v39 }
 0x208   : > { %v1470_v12 = vpop.eup %1469  ;;  %1489 = vpow2.f32 %v742_v13  ;;  %v748_v0 = vmul.f32 1.442695, %v660_v19  ;;  %v750_v21 = vmul.f32 1.442695, %v661_v9  ;;  %v805_v11 = vadd.f32 %v1466_v63, %v1464_v60  ;;  %v2514_v60 = vld [vmem:[#allocation31_spill] sm:$0xff] }
 0x209   : > { %v1472_v25 = vpop.eup %1471  ;;  %1491 = vpow2.f32 %v744_v53  ;;  %v752_v48 = vmul.f32 1.442695, %v662_v58  ;;  %v802_v55 = vadd.f32 %v1462_v56, %v801_v57  ;;  %v754_v17 = vmul.f32 1.442695, %v663_v20 }
 0x20a   : > { %v1474_v7 = vpop.eup %1473  ;;  %1493 = vpow2.f32 %v746_v6  ;;  %v806_v10 = vadd.f32 %v1468_v54, %v805_v11  ;;  %v2265_v35 = vpop.xlane.xlu0 %612  ;;  %v2515_v11 = vld [vmem:[#allocation32_spill] sm:$0xff] }
 0x20b   : > { %v1476_v40 = vpop.eup %1475  ;;  %1495 = vpow2.f32 %v748_v0  ;;  %803 = vadd.xlane.f32.xlu1 %v802_v55  ;;  %v664_v61 = vsub.f32 %v2117_v62, %v2265_v35  ;;  %v665_v39 = vsub.f32 %v2123_v5, %v2265_v35  ;;  %v666_v13 = vsub.f32 %v2514_v60, %v2265_v35 }
 0x20c   : > { %v1478_v53 = vpop.eup %1477  ;;  %1497 = vpow2.f32 %v750_v21  ;;  %v807_v56 = vadd.f32 %v1470_v12, %v806_v10  ;;  %v667_v63 = vsub.f32 %v2135_v34, %v2265_v35  ;;  %v2275_v6 = vpop.xlane.xlu1 %617  ;;  %v810_v19 = vadd.f32 %v1474_v7, %v1472_v25  ;;  %v2516_v12 = vld [vmem:[#allocation33_spill] sm:$0xff] }
 0x20d   : > { %v1480_v9 = vpop.eup %1479  ;;  %1499 = vpow2.f32 %v752_v48  ;;  %v756_v54 = vmul.f32 1.442695, %v664_v61  ;;  %v758_v58 = vmul.f32 1.442695, %v665_v39  ;;  %v760_v20 = vmul.f32 1.442695, %v666_v13 }
 0x20e   : > { %v1482_v57 = vpop.eup %1481  ;;  %1501 = vpow2.f32 %v754_v17  ;;  %808 = vadd.xlane.f32.xlu0 %v807_v56  ;;  %v762_v0 = vmul.f32 1.442695, %v667_v63  ;;  %v668_v55 = vsub.f32 %v2515_v11, %v2275_v6  ;;  %v669_v21 = vsub.f32 %v2516_v12, %v2275_v6 }
 0x20f   : > { %v1484_v10 = vpop.eup %1483  ;;  %1503 = vpow2.f32 %v756_v54  ;;  %v670_v25 = vsub.f32 %v2138_v43, %v2275_v6  ;;  %v671_v48 = vsub.f32 %v2144_v51, %v2275_v6  ;;  %v811_v7 = vadd.f32 %v1476_v40, %v810_v19 }
 0x210   : > { %v1486_v61 = vpop.eup %1485  ;;  %1505 = vpow2.f32 %v758_v58  ;;  %v764_v17 = vmul.f32 1.442695, %v668_v55  ;;  %v766_v39 = vmul.f32 1.442695, %v669_v21  ;;  %v815_v13 = vadd.f32 %v1482_v57, %v1480_v9 }
 0x211   : > { %v1488_v56 = vpop.eup %1487  ;;  %1507 = vpow2.f32 %v760_v20  ;;  %v768_v63 = vmul.f32 1.442695, %v670_v25  ;;  %v812_v11 = vadd.f32 %v1478_v53, %v811_v7  ;;  %v770_v12 = vmul.f32 1.442695, %v671_v48 }
 0x212   : > { %v1490_v34 = vpop.eup %1489  ;;  %1509 = vpow2.f32 %v762_v0  ;;  %v816_v54 = vadd.f32 %v1484_v10, %v815_v13  ;;  %v2285_v60 = vpop.xlane.xlu0 %622 }
 0x213   : > { %v1492_v43 = vpop.eup %1491  ;;  %1511 = vpow2.f32 %v764_v17  ;;  %813 = vadd.xlane.f32.xlu1 %v812_v11  ;;  %v672_v40 = vsub.f32 %v2149_v3, %v2285_v60  ;;  %v673_v19 = vsub.f32 %v2155_v30, %v2285_v60  ;;  %v674_v9 = vsub.f32 %v2152_v18, %v2285_v60 }
 0x214   : > { %v1494_v58 = vpop.eup %1493  ;;  %1513 = vpow2.f32 %v766_v39  ;;  %v817_v53 = vadd.f32 %v1486_v61, %v816_v54  ;;  %v675_v20 = vsub.f32 %v2161_v22, %v2285_v60  ;;  %v820_v57 = vadd.f32 %v1490_v34, %v1488_v56 }
 0x215   : > { %v1496_v0 = vpop.eup %1495  ;;  %1515 = vpow2.f32 %v768_v63  ;;  %v772_v55 = vmul.f32 1.442695, %v672_v40  ;;  %v774_v11 = vmul.f32 1.442695, %v673_v19  ;;  %v776_v10 = vmul.f32 1.442695, %v674_v9 }
 0x216   : > { %v1498_v21 = vpop.eup %1497  ;;  %1517 = vpow2.f32 %v770_v12  ;;  %818 = vadd.xlane.f32.xlu0 %v817_v53  ;;  %v821_v25 = vadd.f32 %v1492_v43, %v820_v57  ;;  %v778_v39 = vmul.f32 1.442695, %v675_v20 }
 0x217   : > { %v1500_v48 = vpop.eup %1499  ;;  %1519 = vpow2.f32 %v772_v55  ;;  %v825_v7 = vadd.f32 %v1498_v21, %v1496_v0 }
 0x218   : > { %v1502_v17 = vpop.eup %1501  ;;  %1521 = vpow2.f32 %v774_v11  ;;  %v822_v61 = vadd.f32 %v1494_v58, %v821_v25 }
 0x219   : > { %v1504_v13 = vpop.eup %1503  ;;  %v826_v54 = vadd.f32 %v1500_v48, %v825_v7  ;;  %1523 = vpow2.f32 %v776_v10 }
 0x21a   : > { %v1506_v22 = vpop.eup %1505  ;;  %823 = vadd.xlane.f32.xlu1 %v822_v61  ;;  %1525 = vpow2.f32 %v778_v39 }
 0x21b   : > { %v1508_v34 = vpop.eup %1507  ;;  %v827_v56 = vadd.f32 %v1502_v17, %v826_v54  ;;  %v830_v63 = vadd.f32 %v1506_v22, %v1504_v13 }
 0x21c   : > { %v1510_v40 = vpop.eup %1509 }
 0x21d   : > { %v1512_v12 = vpop.eup %1511  ;;  %828 = vadd.xlane.f32.xlu0 %v827_v56  ;;  %v831_v43 = vadd.f32 %v1508_v34, %v830_v63 }
 0x21e   : > { %v1514_v19 = vpop.eup %1513 }
 0x21f   : > { %v1516_v9 = vpop.eup %1515  ;;  %v832_v53 = vadd.f32 %v1510_v40, %v831_v43  ;;  %v835_v57 = vadd.f32 %v1514_v19, %v1512_v12 }
 0x220   : > { %v1518_v0 = vpop.eup %1517 }
 0x221   : > { %v1520_v20 = vpop.eup %1519  ;;  %833 = vadd.xlane.f32.xlu1 %v832_v53  ;;  %v836_v58 = vadd.f32 %v1516_v9, %v835_v57 }
 0x222   : > { %v1522_v55 = vpop.eup %1521 }
 0x223   : > { %v837_v11 = vadd.f32 %v1518_v0, %v836_v58  ;;  %v840_v21 = vadd.f32 %v1522_v55, %v1520_v20  ;;  %v1524_v10 = vpop.eup %1523  ;;  %v2517_v55 = vld [vmem:[#allocation12_spill] sm:$0xff] }
 0x224   : > { %v1526_v25 = vpop.eup %1525 }
 0x225   : > { %838 = vadd.xlane.f32.xlu0 %v837_v11  ;;  %v841_v22 = vadd.f32 %v1524_v10, %v840_v21  ;;  %v2518_v10 = vld [vmem:[#allocation14_spill] sm:$0xff] }
 0x227   : > { %v842_v48 = vadd.f32 %v1526_v25, %v841_v22  ;;  %v2519_v25 = vld [vmem:[#allocation13_spill] sm:$0xff] }
 0x229   : > { %843 = vadd.xlane.f32.xlu1 %v842_v48 }
 0x288   : > { %v784_v7 = vpop.xlane.xlu1 %783 }
 0x289   : > { %1527 = vlog2.f32 %v784_v7  ;;  %v2520_v7 = vld [vmem:[#allocation17_spill] sm:$0xff] }
 0x28b   : > { %v789_v17 = vpop.xlane.xlu0 %788 }
 0x28c   : > { %1529 = vlog2.f32 %v789_v17 }
 0x290   : > { %v794_v39 = vpop.xlane.xlu1 %793 }
 0x291   : > { %1531 = vlog2.f32 %v794_v39 }
 0x293   : > { %v1528_v61 = vpop.eup %1527  ;;  %v799_v13 = vpop.xlane.xlu0 %798 }
 0x294   : > { %v846_v54 = vmul.f32 0.6931472, %v1528_v61  ;;  %1533 = vlog2.f32 %v799_v13  ;;  %v2521_v61 = vld [vmem:[#allocation37_spill] sm:$0xff] }
 0x296   : > { %v1530_v34 = vpop.eup %1529  ;;  %v871_v56 = vadd.f32 %v846_v54, %v2165_v24 }
 0x297   : > { %v848_v63 = vmul.f32 0.6931472, %v1530_v34 }
 0x298   : > { %v884_v40 = vsub.f32 %v1956_v28, %v871_v56  ;;  %v885_v12 = vsub.f32 %v1962_v32, %v871_v56  ;;  %v886_v43 = vsub.f32 %v1959_v31, %v871_v56  ;;  %v887_v19 = vsub.f32 %v1975_v41, %v871_v56  ;;  %v804_v9 = vpop.xlane.xlu1 %803  ;;  %v2522_v56 = vld [vmem:[#allocation15_spill] sm:$0xff] }
 0x299   : > { %v872_v53 = vadd.f32 %v848_v63, %v2175_v27  ;;  %1535 = vlog2.f32 %v804_v9 }
 0x29a   : > { %v1298_v57 = vpack.c.bf16 %v885_v12, %v884_v40  ;;  %v1299_v0 = vpack.c.bf16 %v887_v19, %v886_v43  ;;  %v2523_v40 = vld [vmem:[#allocation16_spill] sm:$0xff]  ;;  %v2524_v12 = vld [vmem:[#allocation18_spill] sm:$0xff] }
 0x29b   : > { %v1532_v20 = vpop.eup %1531  ;;  %v888_v58 = vsub.f32 %v1967_v36, %v872_v53  ;;  %v889_v24 = vsub.f32 %v2517_v55, %v872_v53  ;;  %v890_v11 = vsub.f32 %v1978_v42, %v872_v53  ;;  %v891_v28 = vsub.f32 %v1989_v52, %v872_v53  ;;  %v809_v32 = vpop.xlane.xlu0 %808  ;;  %v2525_v19 = vld [vmem:[#allocation20_spill] sm:$0xff]  ;;  %v2526_v55 = vld [vmem:[#allocation38_spill] sm:$0xff] }
 0x29c   : > { %1096 = vst [vmem:[%s2306_s20] sm:$0xff] %v1298_v57  ;;  %1097 = vst [vmem:[%s2306_s20 + $0x8] sm:$0xff] %v1299_v0  ;;  %v850_v31 = vmul.f32 0.6931472, %v1532_v20  ;;  %1537 = vlog2.f32 %v809_v32  ;;  %v2527_v32 = vld [vmem:[#allocation19_spill] sm:$0xff] }
 0x29d   : > { %v1300_v41 = vpack.c.bf16 %v889_v24, %v888_v58  ;;  %v1301_v27 = vpack.c.bf16 %v891_v28, %v890_v11 }
 0x29e   : > { %v1534_v36 = vpop.eup %1533  ;;  %v873_v21 = vadd.f32 %v850_v31, %v2185_v33 }
 0x29f   : > { %1098 = vst [vmem:[%s2306_s20 + $0x10] sm:$0xff] %v1300_v41  ;;  %1099 = vst [vmem:[%s2306_s20 + $0x18] sm:$0xff] %v1301_v27  ;;  %v852_v42 = vmul.f32 0.6931472, %v1534_v36  ;;  %v2528_v41 = vld [vmem:[#allocation22_spill] sm:$0xff]  ;;  %v2529_v36 = vld [vmem:[#allocation21_spill] sm:$0xff] }
 0x2a0   : > { %v892_v52 = vsub.f32 %v1986_v49, %v873_v21  ;;  %v893_v22 = vsub.f32 %v2518_v10, %v873_v21  ;;  %v894_v48 = vsub.f32 %v2519_v25, %v873_v21  ;;  %v895_v17 = vsub.f32 %v2520_v7, %v873_v21  ;;  %v814_v39 = vpop.xlane.xlu1 %813 }
 0x2a1   : > { %v874_v13 = vadd.f32 %v852_v42, %v2521_v61  ;;  %1539 = vlog2.f32 %v814_v39  ;;  %v2530_v42 = vld [vmem:[#allocation25_spill] sm:$0xff]  ;;  %v2532_v61 = vld [vmem:[#allocation24_spill] sm:$0xff] }
 0x2a2   : > { %v1302_v54 = vpack.c.bf16 %v893_v22, %v892_v52  ;;  %v1303_v33 = vpack.c.bf16 %v895_v17, %v894_v48  ;;  %v2531_v17 = vld [vmem:[#allocation23_spill] sm:$0xff] }
 0x2a3   : > { %v1536_v34 = vpop.eup %1535  ;;  %v896_v63 = vsub.f32 %v2522_v56, %v874_v13  ;;  %v897_v49 = vsub.f32 %v2523_v40, %v874_v13  ;;  %v898_v43 = vsub.f32 %v2524_v12, %v874_v13  ;;  %v899_v9 = vsub.f32 %v2525_v19, %v874_v13  ;;  %v819_v53 = vpop.xlane.xlu0 %818 }
 0x2a4   : > { %1100 = vst [vmem:[%s2306_s20 + $0x20] sm:$0xff] %v1302_v54  ;;  %1101 = vst [vmem:[%s2306_s20 + $0x28] sm:$0xff] %v1303_v33  ;;  %v854_v57 = vmul.f32 0.6931472, %v1536_v34  ;;  %1541 = vlog2.f32 %v819_v53  ;;  %v2533_v54 = vld [vmem:[#allocation26_spill] sm:$0xff] }
 0x2a5   : > { %v1304_v0 = vpack.c.bf16 %v897_v49, %v896_v63  ;;  %v1305_v20 = vpack.c.bf16 %v899_v9, %v898_v43 }
 0x2a6   : > { %v1538_v58 = vpop.eup %1537  ;;  %v875_v24 = vadd.f32 %v854_v57, %v2526_v55 }
 0x2a7   : > { %1102 = vst [vmem:[%s2306_s20 + $0x30] sm:$0xff] %v1304_v0  ;;  %1103 = vst [vmem:[%s2306_s20 + $0x38] sm:$0xff] %v1305_v20  ;;  %v856_v11 = vmul.f32 0.6931472, %v1538_v58  ;;  %v824_v28 = vpop.xlane.xlu1 %823 }
 0x2a8   : > { %v900_v31 = vsub.f32 %v2527_v32, %v875_v24  ;;  %v901_v27 = vsub.f32 %v2528_v41, %v875_v24  ;;  %v902_v21 = vsub.f32 %v2529_v36, %v875_v24  ;;  %v903_v52 = vsub.f32 %v2530_v42, %v875_v24  ;;  %v2534_v24 = vld [vmem:[#allocation27_spill] sm:$0xff] }
 0x2a9   : > { %v876_v10 = vadd.f32 %v856_v11, %v2215_v46  ;;  %1543 = vlog2.f32 %v824_v28  ;;  %v2535_v28 = vld [vmem:[#allocation28_spill] sm:$0xff] }
 0x2aa   : > { %v1306_v22 = vpack.c.bf16 %v901_v27, %v900_v31  ;;  %v1307_v25 = vpack.c.bf16 %v903_v52, %v902_v21  ;;  %v829_v48 = vpop.xlane.xlu0 %828 }
 0x2ab   : > { %v1540_v7 = vpop.eup %1539  ;;  %v904_v39 = vsub.f32 %v2531_v17, %v876_v10  ;;  %v905_v13 = vsub.f32 %v2532_v61, %v876_v10  ;;  %v906_v33 = vsub.f32 %v2533_v54, %v876_v10  ;;  %v907_v34 = vsub.f32 %v2048_v29, %v876_v10  ;;  %v2537_v17 = vld [vmem:[#allocation30_spill] sm:$0xff] }
 0x2ac   : > { %1104 = vst [vmem:[%s2306_s20 + $0x40] sm:$0xff] %v1306_v22  ;;  %1105 = vst [vmem:[%s2306_s20 + $0x48] sm:$0xff] %v1307_v25  ;;  %v858_v56 = vmul.f32 0.6931472, %v1540_v7  ;;  %1545 = vlog2.f32 %v829_v48  ;;  %v2536_v48 = vld [vmem:[#allocation29_spill] sm:$0xff] }
 0x2ad   : > { %v1308_v46 = vpack.c.bf16 %v905_v13, %v904_v39  ;;  %v1309_v63 = vpack.c.bf16 %v907_v34, %v906_v33  ;;  %v2539_v33 = vld [vmem:[#allocation34_spill] sm:$0xff] }
 0x2ae   : > { %v1542_v40 = vpop.eup %1541  ;;  %v877_v49 = vadd.f32 %v858_v56, %v2225_v4  ;;  %v834_v12 = vpop.xlane.xlu1 %833 }
 0x2af   : > { %1106 = vst [vmem:[%s2306_s20 + $0x50] sm:$0xff] %v1308_v46  ;;  %1107 = vst [vmem:[%s2306_s20 + $0x58] sm:$0xff] %v1309_v63  ;;  %v860_v43 = vmul.f32 0.6931472, %v1542_v40  ;;  %1547 = vlog2.f32 %v834_v12 }
 0x2b0   : > { %v908_v19 = vsub.f32 %v2053_v38, %v877_v49  ;;  %v909_v29 = vsub.f32 %v2059_v45, %v877_v49  ;;  %v910_v9 = vsub.f32 %v2056_v44, %v877_v49  ;;  %v911_v53 = vsub.f32 %v2071_v59, %v877_v49  ;;  %v2541_v49 = vld [vmem:[#allocation33_spill] sm:$0xff] }
 0x2b1   : > { %v878_v57 = vadd.f32 %v860_v43, %v2235_v23  ;;  %v2542_v43 = vld [vmem:[#allocation35_spill] sm:$0xff] }
 0x2b2   : > { %v1310_v0 = vpack.c.bf16 %v909_v29, %v908_v19  ;;  %v1311_v20 = vpack.c.bf16 %v911_v53, %v910_v9  ;;  %v839_v4 = vpop.xlane.xlu0 %838 }
 0x2b3   : > { %v1544_v58 = vpop.eup %1543  ;;  %v912_v55 = vsub.f32 %v2063_v50, %v878_v57  ;;  %v913_v11 = vsub.f32 %v2534_v24, %v878_v57  ;;  %v914_v38 = vsub.f32 %v2535_v28, %v878_v57  ;;  %v915_v45 = vsub.f32 %v2080_v2, %v878_v57 }
 0x2b4   : > { %1108 = vst [vmem:[%s2306_s20 + $0x60] sm:$0xff] %v1310_v0  ;;  %1109 = vst [vmem:[%s2306_s20 + $0x68] sm:$0xff] %v1311_v20  ;;  %v862_v44 = vmul.f32 0.6931472, %v1544_v58  ;;  %1549 = vlog2.f32 %v839_v4  ;;  %v2543_v4 = vld [vmem:[#allocation36_spill] sm:$0xff] }
 0x2b5   : > { %v1312_v59 = vpack.c.bf16 %v913_v11, %v912_v55  ;;  %v1313_v23 = vpack.c.bf16 %v915_v45, %v914_v38 }
 0x2b6   : > { %v1546_v32 = vpop.eup %1545  ;;  %v879_v31 = vadd.f32 %v862_v44, %v2245_v15  ;;  %v844_v41 = vpop.xlane.xlu1 %843 }
 0x2b7   : > { %1110 = vst [vmem:[%s2306_s20 + $0x70] sm:$0xff] %v1312_v59  ;;  %1111 = vst [vmem:[%s2306_s20 + $0x78] sm:$0xff] %v1313_v23  ;;  %v864_v50 = vmul.f32 0.6931472, %v1546_v32  ;;  %1551 = vlog2.f32 %v844_v41 }
 0x2b8   : > { %v916_v27 = vsub.f32 %v2085_v8, %v879_v31  ;;  %v917_v2 = vsub.f32 %v2091_v16, %v879_v31  ;;  %v918_v36 = vsub.f32 %v2088_v14, %v879_v31  ;;  %v919_v21 = vsub.f32 %v2103_v37, %v879_v31 }
 0x2b9   : > { %v1548_v42 = vpop.eup %1547  ;;  %v880_v52 = vadd.f32 %v864_v50, %v2255_v1 }
 0x2ba   : > { %v1314_v10 = vpack.c.bf16 %v917_v2, %v916_v27  ;;  %v1315_v15 = vpack.c.bf16 %v919_v21, %v918_v36  ;;  %v866_v22 = vmul.f32 0.6931472, %v1548_v42 }
 0x2bb   : > { %v920_v25 = vsub.f32 %v2095_v26, %v880_v52  ;;  %v921_v7 = vsub.f32 %v2536_v48, %v880_v52  ;;  %v922_v8 = vsub.f32 %v2537_v17, %v880_v52  ;;  %v923_v16 = vsub.f32 %v2112_v47, %v880_v52  ;;  %v2538_v26 = vld [vmem:[#allocation31_spill] sm:$0xff] }
 0x2bc   : > { %1112 = vst [vmem:[%s2306_s20 + $0x80] sm:$0xff] %v1314_v10  ;;  %1113 = vst [vmem:[%s2306_s20 + $0x88] sm:$0xff] %v1315_v15  ;;  %v881_v14 = vadd.f32 %v866_v22, %v2265_v35 }
 0x2bd   : > { %v1316_v37 = vpack.c.bf16 %v921_v7, %v920_v25  ;;  %v1317_v1 = vpack.c.bf16 %v923_v16, %v922_v8 }
 0x2be   : > { %v1550_v39 = vpop.eup %1549  ;;  %v924_v61 = vsub.f32 %v2117_v62, %v881_v14  ;;  %v925_v13 = vsub.f32 %v2123_v5, %v881_v14  ;;  %v926_v54 = vsub.f32 %v2538_v26, %v881_v14  ;;  %v927_v34 = vsub.f32 %v2539_v33, %v881_v14  ;;  %v2540_v5 = vld [vmem:[#allocation32_spill] sm:$0xff] }
 0x2bf   : > { %1114 = vst [vmem:[%s2306_s20 + $0x90] sm:$0xff] %v1316_v37  ;;  %1115 = vst [vmem:[%s2306_s20 + $0x98] sm:$0xff] %v1317_v1  ;;  %v868_v47 = vmul.f32 0.6931472, %v1550_v39 }
 0x2c0   : > { %v1318_v56 = vpack.c.bf16 %v925_v13, %v924_v61  ;;  %v1319_v46 = vpack.c.bf16 %v927_v34, %v926_v54 }
 0x2c1   : > { %v1552_v35 = vpop.eup %1551  ;;  %v882_v63 = vadd.f32 %v868_v47, %v2275_v6 }
 0x2c2   : > { %1116 = vst [vmem:[%s2306_s20 + $0xa0] sm:$0xff] %v1318_v56  ;;  %1117 = vst [vmem:[%s2306_s20 + $0xa8] sm:$0xff] %v1319_v46  ;;  %v870_v62 = vmul.f32 0.6931472, %v1552_v35 }
 0x2c3   : > { %v928_v40 = vsub.f32 %v2540_v5, %v882_v63  ;;  %v929_v12 = vsub.f32 %v2541_v49, %v882_v63  ;;  %v930_v19 = vsub.f32 %v2542_v43, %v882_v63  ;;  %v931_v29 = vsub.f32 %v2144_v51, %v882_v63 }
 0x2c4   : > { %v883_v9 = vadd.f32 %v870_v62, %v2285_v60 }
 0x2c5   : > { %v1320_v6 = vpack.c.bf16 %v929_v12, %v928_v40  ;;  %v1321_v53 = vpack.c.bf16 %v931_v29, %v930_v19 }
 0x2c6   : > { %v932_v57 = vsub.f32 %v2149_v3, %v883_v9  ;;  %v933_v0 = vsub.f32 %v2155_v30, %v883_v9  ;;  %v934_v20 = vsub.f32 %v2152_v18, %v883_v9  ;;  %v935_v58 = vsub.f32 %v2543_v4, %v883_v9 }
 0x2c7   : > { %1118 = vst [vmem:[%s2306_s20 + $0xb0] sm:$0xff] %v1320_v6  ;;  %1119 = vst [vmem:[%s2306_s20 + $0xb8] sm:$0xff] %v1321_v53 }
 0x2c8   : > { %v1322_v51 = vpack.c.bf16 %v933_v0, %v932_v57  ;;  %v1323_v60 = vpack.c.bf16 %v935_v58, %v934_v20 }
 0x2ca   : > { %1120 = vst [vmem:[%s2306_s20 + $0xc0] sm:$0xff] %v1322_v51  ;;  %1121 = vst [vmem:[%s2306_s20 + $0xc8] sm:$0xff] %v1323_v60 }
 0x2cb   : > { %1652 = shalt.err (!%p1649_p2)
}
 0x2cc   : > { %s1653_s11 = scalar_lea.hbm %s2392_s27, 3328  ;;  %s1657_s22 = scalar_lea.hbm %s2443_s3, 6656 }
 0x2cd   : > { %p1654_p13 = scmp.ne.s32.totalorder %s2392_s27, %s1653_s11  ;;  %p1658_p4 = scmp.lt.u32.totalorder %s2392_s27, %s2443_s3 }
 0x2ce   : > { %p1659_p5 = scmp.lt.u32.totalorder %s1657_s22, %s1653_s11  ;;  %p1661_p11 = scmp.lt.u32.totalorder %s1653_s11, %s2392_s27 }
 0x2cf   : > { %p1655_p6 = pnand %p1654_p13, %p2544_p0 }
 0x2d0   : > { %p1660_p8 = por %p1659_p5, %p1658_p4 }
 0x2d1   : > { %p1656_p10 = pneg %p1655_p6 }
 0x2d2   : > { %p1662_p1 = por %p1661_p11, %p1660_p8 }
 0x2d4   : > { %p1663_p3 = pnand %p1662_p1, %p1656_p10 }
 0x2d6   : > { %1666 = shalt.err (!%p1663_p3)
}
 0x2d7   : > { %s1720_s18 = smov 256   ;;  %s1721_s20 = smov 16  }
 0x2d8   : > { %1340 = dma.vmem_to_hbm [thread:$0]  (%p2544_p0), %s2394_s21, 3328, %s2392_s27, %s1123_s23, %s1720_s18, %s1720_s18, %s1721_s20  }
 0x2d9 PF: > { %s1152_s10 = sand.u32 1, %s1697_s12   ;;  %p2545_p7 = scmp.ne.s32.totalorder %s2478_s19, 0 }
 0x2da   : > { %p2546_p9 = scmp.ge.s32.totalorder %s1709_s15, 2  ;;  %s1153_s26 = scalar_lea.sflag [#allocation4], %s1152_s10 }
 0x2dc   : > { %p1354_p12 = pnand %p2546_p9, %p2545_p7 }
 0x2de   : > { %1692 = dma.done.wait (!%p1354_p12), %s1153_s26, 3328  }
 0x2df   : > { %1694 = vsyncadd (!%p1354_p12), %s1153_s26, 4294963968  ;;  %p17_p2 = scmp.ge.s32.totalorder %s1852_s4, 4   ;;  %s2547_s12 = smov %s1701_s13 }
 0x2e0   : > { %s2548_s13 = smov %s1705_s14  ;;  %s2549_s14 = smov %s1868_s7 }
 0x2e1   : > { %s2550_s15 = smov %s1852_s4  ;;  %19 = sbr.rel (!%p17_p2) target bundleno = 6 (0x6), region = 85 }
 0x2e8   :  { %1158 = vsyncpa [#allocation3], 1 }
 0x2e9   :  { %1160 = vsyncpa [#allocation3 + $0x1], 1 }
 0x2ea   :  { %1161 = vsyncpa [#allocation6], 1 }
 0x2eb   :  { %1162 = vsyncpa [#allocation4], 1 }
 0x2ec   :  { %1164 = vsyncpa [#allocation4 + $0x1], 1 }

</bundles_post_ra>
